<compile_context>
chip_gen: v7x
topology: tpu7x:2x2x1
jax: 0.10.0
libtpu: 0.0.40
codegen_flags: <defaults>
</compile_context>

<pallas_src>
import math
import functools

import jax
import jax.numpy as jnp
from jax.experimental import pallas as pl
from jax.experimental.pallas import tpu as pltpu


# ----------------------------------------------------------------------------
# Fused encoder-block kernel
# ----------------------------------------------------------------------------

def _layernorm(x, g, b, eps=1e-5):
    mu = jnp.mean(x, axis=-1, keepdims=True)
    var = jnp.mean((x - mu) ** 2, axis=-1, keepdims=True)
    return (x - mu) * jax.lax.rsqrt(var + eps) * g + b


def _encoder_block_kernel(
    x_ref, mask_ref,
    wqkv_ref, bqkv_ref, wo_ref, bo_ref,
    g1_ref, be1_ref,
    w1_ref, b1_ref, w2_ref, b2_ref,
    g2_ref, be2_ref,
    o_ref, *, num_heads, batch,
):
    x = x_ref[...]                             # [(B*L), E] f32
    M, E = x.shape
    L = M // batch
    Dh = E // num_heads
    mask_add = mask_ref[...]                   # [B, L] additive key mask (0 / -1e9)

    # ---- fused QKV projection over the whole (B*L) slab (bf16 MXU, f32 acc) ---
    qkv = jnp.dot(x.astype(jnp.bfloat16), wqkv_ref[...],
                  preferred_element_type=jnp.float32) + bqkv_ref[...]

    # ---- multi-head attention, per batch element (static unrolled loops) ------
    # NOTE: 1/sqrt(Dh) is already folded into the Q columns of w_qkv/b_qkv.
    batch_outs = []
    for b in range(batch):
        q_b = qkv[b * L:(b + 1) * L, 0:E].astype(jnp.bfloat16)
        k_b = qkv[b * L:(b + 1) * L, E:2 * E].astype(jnp.bfloat16)
        v_b = qkv[b * L:(b + 1) * L, 2 * E:3 * E].astype(jnp.bfloat16)
        m_b = mask_add[b:b + 1, :]             # [1, L] broadcast over query rows
        head_outs = []
        for h in range(num_heads):
            qh = q_b[:, h * Dh:(h + 1) * Dh]
            kh = k_b[:, h * Dh:(h + 1) * Dh]
            vh = v_b[:, h * Dh:(h + 1) * Dh]
            s = jnp.dot(qh, kh.T, preferred_element_type=jnp.float32) + m_b
            s = s - jnp.max(s, axis=-1, keepdims=True)
            p = jnp.exp(s)
            p = p * pl.reciprocal(jnp.sum(p, axis=-1, keepdims=True), approx=True)
            head_outs.append(jnp.dot(p.astype(jnp.bfloat16), vh,
                                     preferred_element_type=jnp.float32))
        batch_outs.append(jnp.concatenate(head_outs, axis=-1))    # [L, E]
    attn = jnp.concatenate(batch_outs, axis=0)                    # [(B*L), E]

    # ---- output projection + residual + LayerNorm1 -----------------------------
    attn = jnp.dot(attn.astype(jnp.bfloat16), wo_ref[...],
                   preferred_element_type=jnp.float32) + bo_ref[...]
    h1 = _layernorm(attn + x, g1_ref[...], be1_ref[...])

    # ---- feed-forward + residual + LayerNorm2 (hidden never leaves VMEM/vregs) --
    ff = jnp.dot(h1.astype(jnp.bfloat16), w1_ref[...],
                 preferred_element_type=jnp.float32) + b1_ref[...]
    ff = jnp.maximum(ff, 0.0)
    ff = jnp.dot(ff.astype(jnp.bfloat16), w2_ref[...],
                 preferred_element_type=jnp.float32) + b2_ref[...]
    o_ref[...] = _layernorm(ff + h1, g2_ref[...], be2_ref[...])


# ----------------------------------------------------------------------------
# Parameter prep (one-time, outside the kernel)
# ----------------------------------------------------------------------------

def prepare_params(params_f32, num_heads):
    """Fold 1/sqrt(Dh) into the Q columns of the fused QKV weight/bias and cast
    matmul weights to bfloat16 (biases and LayerNorm params stay f32)."""
    E = params_f32["w_o"].shape[0]
    Dh = E // num_heads
    scale = jnp.float32(1.0 / math.sqrt(Dh))
    w_qkv = params_f32["w_qkv"].astype(jnp.float32).at[:, :E].multiply(scale)
    b_qkv = params_f32["b_qkv"].astype(jnp.float32).at[:, :E].multiply(scale)
    return {
        "w_qkv": w_qkv.astype(jnp.bfloat16),
        "b_qkv": b_qkv,
        "w_o":   params_f32["w_o"].astype(jnp.bfloat16),
        "b_o":   params_f32["b_o"],
        "ln1_g": params_f32["ln1_g"], "ln1_b": params_f32["ln1_b"],
        "w1":    params_f32["w1"].astype(jnp.bfloat16),
        "b1":    params_f32["b1"],
        "w2":    params_f32["w2"].astype(jnp.bfloat16),
        "b2":    params_f32["b2"],
        "ln2_g": params_f32["ln2_g"], "ln2_b": params_f32["ln2_b"],
    }


# ----------------------------------------------------------------------------
# Wrapper
# ----------------------------------------------------------------------------

def encoder_transformer_block(x, src_mask, params, num_heads):
    """Fused EncoderTransformerBlock forward.

    x:        [B, L, E] float32
    src_mask: [B, L] bool, True = padded key position (nn.MultiheadAttention
              key_padding_mask semantics).
    params:   output of prepare_params (bf16 weights, f32 biases/LN params).
    """
    B, L, E = x.shape
    x2d = x.reshape(B * L, E)
    mask_add = jnp.where(src_mask, jnp.float32(-1e9), jnp.float32(0.0))  # [B, L]

    args = (
        x2d, mask_add,
        params["w_qkv"], params["b_qkv"], params["w_o"], params["b_o"],
        params["ln1_g"], params["ln1_b"],
        params["w1"], params["b1"], params["w2"], params["b2"],
        params["ln2_g"], params["ln2_b"],
    )

    # Size scoped VMEM from the actual resident set (single-buffered, no grid).
    out_bytes = B * L * E * 4
    resident = sum(int(a.size) * a.dtype.itemsize for a in args) + out_bytes
    vmem_limit = int(min(max(4 * resident + (1 << 20), 4 << 20), 96 << 20))

    vmem_spec = pl.BlockSpec(memory_space=pltpu.MemorySpace.VMEM)
    kernel = functools.partial(_encoder_block_kernel, num_heads=num_heads, batch=B)
    out2d = pl.pallas_call(
        kernel,
        out_shape=jax.ShapeDtypeStruct((B * L, E), jnp.float32),
        in_specs=[vmem_spec] * len(args),
        out_specs=vmem_spec,
        compiler_params=pltpu.CompilerParams(vmem_limit_bytes=vmem_limit),
    )(*args)
    return out2d.reshape(B, L, E)


# ----------------------------------------------------------------------------
# Pure-JAX reference (f32, mirrors the PyTorch module in eval mode)
# ----------------------------------------------------------------------------

def reference_block(x, src_mask, params, num_heads):
    B, L, E = x.shape
    Dh = E // num_heads
    scale = 1.0 / math.sqrt(Dh)

    qkv = jnp.einsum("ble,ef->blf", x, params["w_qkv"]) + params["b_qkv"]
    q, k, v = qkv[..., :E], qkv[..., E:2 * E], qkv[..., 2 * E:]

    def split(t):
        return t.reshape(B, L, num_heads, Dh).transpose(0, 2, 1, 3)

    q, k, v = split(q), split(k), split(v)
    s = jnp.einsum("bhqd,bhkd->bhqk", q, k) * scale
    s = s + jnp.where(src_mask, -1e9, 0.0)[:, None, None, :]
    p = jax.nn.softmax(s, axis=-1)
    o = jnp.einsum("bhqk,bhkd->bhqd", p, v).transpose(0, 2, 1, 3).reshape(B, L, E)
    o = o @ params["w_o"] + params["b_o"]

    def ln(t, g, b):
        mu = t.mean(-1, keepdims=True)
        var = ((t - mu) ** 2).mean(-1, keepdims=True)
        return (t - mu) / jnp.sqrt(var + 1e-5) * g + b

    h1 = ln(o + x, params["ln1_g"], params["ln1_b"])
    ff = jnp.maximum(h1 @ params["w1"] + params["b1"], 0.0) @ params["w2"] + params["b2"]
    return ln(ff + h1, params["ln2_g"], params["ln2_b"])


# ----------------------------------------------------------------------------
# Main
# ----------------------------------------------------------------------------

if __name__ == "__main__":
    B, L, E, H, F = 2, 8, 32, 4, 64

    key = jax.random.PRNGKey(0)
    ks = jax.random.split(key, 10)
    params_f32 = {
        "w_qkv": 0.05 * jax.random.normal(ks[0], (E, 3 * E), jnp.float32),
        "b_qkv": 0.02 * jax.random.normal(ks[1], (1, 3 * E), jnp.float32),
        "w_o":   0.05 * jax.random.normal(ks[2], (E, E), jnp.float32),
        "b_o":   0.02 * jax.random.normal(ks[3], (1, E), jnp.float32),
        "ln1_g": jnp.ones((1, E), jnp.float32),
        "ln1_b": jnp.zeros((1, E), jnp.float32),
        "w1":    0.05 * jax.random.normal(ks[4], (E, F), jnp.float32),
        "b1":    0.02 * jax.random.normal(ks[5], (1, F), jnp.float32),
        "w2":    0.05 * jax.random.normal(ks[6], (F, E), jnp.float32),
        "b2":    0.02 * jax.random.normal(ks[7], (1, E), jnp.float32),
        "ln2_g": jnp.ones((1, E), jnp.float32),
        "ln2_b": jnp.zeros((1, E), jnp.float32),
    }

    x = jax.random.normal(ks[8], (B, L, E), jnp.float32)
    # key_padding_mask: True = masked (pad). Batch 1 has its last 2 keys padded.
    src_mask = jnp.zeros((B, L), dtype=bool).at[1, L - 2:].set(True)

    kparams = prepare_params(params_f32, num_heads=H)
    fwd = jax.jit(functools.partial(encoder_transformer_block,
                                    params=kparams, num_heads=H))
    out = jax.block_until_ready(fwd(x, src_mask))

    ref = reference_block(x, src_mask, params_f32, H)
    assert out.shape == (B, L, E)
    assert bool(jnp.all(jnp.isfinite(out)))
    max_err = float(jnp.max(jnp.abs(out - ref)))
    # Tolerance covers bf16 MXU operands + approx-reciprocal softmax vs f32 ref.
    assert max_err < 2e-2, f"mismatch vs reference: {max_err}"
    print("KERNEL_OK")
</pallas_src>

<mosaic_0001>
module attributes {stable_mosaic.version = 11 : i64} {
  func.func @_encoder_block_kernel(%arg0: memref<16x32xf32, #tpu.memory_space<vmem>>, %arg1: memref<2x8xf32, #tpu.memory_space<vmem>>, %arg2: memref<32x96xbf16, #tpu.memory_space<vmem>>, %arg3: memref<1x96xf32, #tpu.memory_space<vmem>>, %arg4: memref<32x32xbf16, #tpu.memory_space<vmem>>, %arg5: memref<1x32xf32, #tpu.memory_space<vmem>>, %arg6: memref<1x32xf32, #tpu.memory_space<vmem>>, %arg7: memref<1x32xf32, #tpu.memory_space<vmem>>, %arg8: memref<32x64xbf16, #tpu.memory_space<vmem>>, %arg9: memref<1x64xf32, #tpu.memory_space<vmem>>, %arg10: memref<64x32xbf16, #tpu.memory_space<vmem>>, %arg11: memref<1x32xf32, #tpu.memory_space<vmem>>, %arg12: memref<1x32xf32, #tpu.memory_space<vmem>>, %arg13: memref<1x32xf32, #tpu.memory_space<vmem>>, %arg14: memref<16x32xf32, #tpu.memory_space<vmem>>) attributes {dimension_semantics = [], scalar_prefetch = 0 : i64, scratch_operands = 0 : i64, tpu.core_type = #tpu.core_type<tc>} {
    %c0 = arith.constant 0 : index
    %c0_0 = arith.constant 0 : index
    %0 = vector.load %arg0[%c0, %c0_0] : memref<16x32xf32, #tpu.memory_space<vmem>>, vector<16x32xf32>
    %c0_1 = arith.constant 0 : index
    %c0_2 = arith.constant 0 : index
    %1 = vector.load %arg1[%c0_1, %c0_2] : memref<2x8xf32, #tpu.memory_space<vmem>>, vector<2x8xf32>
    %2 = arith.truncf %0 : vector<16x32xf32> to vector<16x32xbf16>
    %c0_3 = arith.constant 0 : index
    %c0_4 = arith.constant 0 : index
    %3 = vector.load %arg2[%c0_3, %c0_4] : memref<32x96xbf16, #tpu.memory_space<vmem>>, vector<32x96xbf16>
    %cst = arith.constant dense<0.000000e+00> : vector<16x96xf32>
    %4 = tpu.matmul %2, %3, %cst {dimension_numbers = #tpu.dot_dimension_numbers<[1], [0], [0], [1], [0, 0, 1, 1], [], []>} : vector<16x32xbf16>, vector<32x96xbf16>, vector<16x96xf32> -> vector<16x96xf32>
    %c0_5 = arith.constant 0 : index
    %c0_6 = arith.constant 0 : index
    %5 = vector.load %arg3[%c0_5, %c0_6] : memref<1x96xf32, #tpu.memory_space<vmem>>, vector<1x96xf32>
    %6 = vector.broadcast %5 : vector<1x96xf32> to vector<16x96xf32>
    %7 = arith.addf %4, %6 : vector<16x96xf32>
    %8 = vector.extract_strided_slice %7 {offsets = [0, 0], sizes = [8, 32], strides = [1, 1]} : vector<16x96xf32> to vector<8x32xf32>
    %9 = arith.truncf %8 : vector<8x32xf32> to vector<8x32xbf16>
    %10 = vector.extract_strided_slice %7 {offsets = [0, 32], sizes = [8, 32], strides = [1, 1]} : vector<16x96xf32> to vector<8x32xf32>
    %11 = arith.truncf %10 : vector<8x32xf32> to vector<8x32xbf16>
    %12 = vector.extract_strided_slice %7 {offsets = [0, 64], sizes = [8, 32], strides = [1, 1]} : vector<16x96xf32> to vector<8x32xf32>
    %13 = arith.truncf %12 : vector<8x32xf32> to vector<8x32xbf16>
    %14 = vector.extract_strided_slice %1 {offsets = [0, 0], sizes = [1, 8], strides = [1, 1]} : vector<2x8xf32> to vector<1x8xf32>
    %15 = vector.extract_strided_slice %9 {offsets = [0, 0], sizes = [8, 8], strides = [1, 1]} : vector<8x32xbf16> to vector<8x8xbf16>
    %16 = vector.extract_strided_slice %11 {offsets = [0, 0], sizes = [8, 8], strides = [1, 1]} : vector<8x32xbf16> to vector<8x8xbf16>
    %17 = vector.extract_strided_slice %13 {offsets = [0, 0], sizes = [8, 8], strides = [1, 1]} : vector<8x32xbf16> to vector<8x8xbf16>
    %18 = tpu.transpose %16, [1, 0] : vector<8x8xbf16> -> vector<8x8xbf16>
    %cst_7 = arith.constant dense<0.000000e+00> : vector<8x8xf32>
    %19 = tpu.matmul %15, %18, %cst_7 {dimension_numbers = #tpu.dot_dimension_numbers<[1], [0], [0], [1], [0, 0, 1, 1], [], []>} : vector<8x8xbf16>, vector<8x8xbf16>, vector<8x8xf32> -> vector<8x8xf32>
    %20 = vector.broadcast %14 : vector<1x8xf32> to vector<8x8xf32>
    %21 = arith.addf %19, %20 : vector<8x8xf32>
    %cst_8 = arith.constant dense<0xFF800000> : vector<8xf32>
    %22 = vector.multi_reduction <maximumf>, %21, %cst_8 [1] : vector<8x8xf32> to vector<8xf32>
    %23 = vector.shape_cast %22 : vector<8xf32> to vector<8x1xf32>
    %24 = vector.broadcast %23 : vector<8x1xf32> to vector<8x8xf32>
    %25 = arith.subf %21, %24 : vector<8x8xf32>
    %26 = math.exp %25 : vector<8x8xf32>
    %cst_9 = arith.constant dense<0.000000e+00> : vector<8xf32>
    %27 = vector.multi_reduction <add>, %26, %cst_9 [1] : vector<8x8xf32> to vector<8xf32>
    %28 = vector.shape_cast %27 : vector<8xf32> to vector<8x1xf32>
    %29 = tpu.reciprocal %28 {approx = true} : vector<8x1xf32> -> vector<8x1xf32>
    %30 = vector.broadcast %29 : vector<8x1xf32> to vector<8x8xf32>
    %31 = arith.mulf %26, %30 : vector<8x8xf32>
    %32 = arith.truncf %31 : vector<8x8xf32> to vector<8x8xbf16>
    %cst_10 = arith.constant dense<0.000000e+00> : vector<8x8xf32>
    %33 = tpu.matmul %32, %17, %cst_10 {dimension_numbers = #tpu.dot_dimension_numbers<[1], [0], [0], [1], [0, 0, 1, 1], [], []>} : vector<8x8xbf16>, vector<8x8xbf16>, vector<8x8xf32> -> vector<8x8xf32>
    %34 = vector.extract_strided_slice %9 {offsets = [0, 8], sizes = [8, 8], strides = [1, 1]} : vector<8x32xbf16> to vector<8x8xbf16>
    %35 = vector.extract_strided_slice %11 {offsets = [0, 8], sizes = [8, 8], strides = [1, 1]} : vector<8x32xbf16> to vector<8x8xbf16>
    %36 = vector.extract_strided_slice %13 {offsets = [0, 8], sizes = [8, 8], strides = [1, 1]} : vector<8x32xbf16> to vector<8x8xbf16>
    %37 = tpu.transpose %35, [1, 0] : vector<8x8xbf16> -> vector<8x8xbf16>
    %cst_11 = arith.constant dense<0.000000e+00> : vector<8x8xf32>
    %38 = tpu.matmul %34, %37, %cst_11 {dimension_numbers = #tpu.dot_dimension_numbers<[1], [0], [0], [1], [0, 0, 1, 1], [], []>} : vector<8x8xbf16>, vector<8x8xbf16>, vector<8x8xf32> -> vector<8x8xf32>
    %39 = vector.broadcast %14 : vector<1x8xf32> to vector<8x8xf32>
    %40 = arith.addf %38, %39 : vector<8x8xf32>
    %cst_12 = arith.constant dense<0xFF800000> : vector<8xf32>
    %41 = vector.multi_reduction <maximumf>, %40, %cst_12 [1] : vector<8x8xf32> to vector<8xf32>
    %42 = vector.shape_cast %41 : vector<8xf32> to vector<8x1xf32>
    %43 = vector.broadcast %42 : vector<8x1xf32> to vector<8x8xf32>
    %44 = arith.subf %40, %43 : vector<8x8xf32>
    %45 = math.exp %44 : vector<8x8xf32>
    %cst_13 = arith.constant dense<0.000000e+00> : vector<8xf32>
    %46 = vector.multi_reduction <add>, %45, %cst_13 [1] : vector<8x8xf32> to vector<8xf32>
    %47 = vector.shape_cast %46 : vector<8xf32> to vector<8x1xf32>
    %48 = tpu.reciprocal %47 {approx = true} : vector<8x1xf32> -> vector<8x1xf32>
    %49 = vector.broadcast %48 : vector<8x1xf32> to vector<8x8xf32>
    %50 = arith.mulf %45, %49 : vector<8x8xf32>
    %51 = arith.truncf %50 : vector<8x8xf32> to vector<8x8xbf16>
    %cst_14 = arith.constant dense<0.000000e+00> : vector<8x8xf32>
    %52 = tpu.matmul %51, %36, %cst_14 {dimension_numbers = #tpu.dot_dimension_numbers<[1], [0], [0], [1], [0, 0, 1, 1], [], []>} : vector<8x8xbf16>, vector<8x8xbf16>, vector<8x8xf32> -> vector<8x8xf32>
    %53 = vector.extract_strided_slice %9 {offsets = [0, 16], sizes = [8, 8], strides = [1, 1]} : vector<8x32xbf16> to vector<8x8xbf16>
    %54 = vector.extract_strided_slice %11 {offsets = [0, 16], sizes = [8, 8], strides = [1, 1]} : vector<8x32xbf16> to vector<8x8xbf16>
    %55 = vector.extract_strided_slice %13 {offsets = [0, 16], sizes = [8, 8], strides = [1, 1]} : vector<8x32xbf16> to vector<8x8xbf16>
    %56 = tpu.transpose %54, [1, 0] : vector<8x8xbf16> -> vector<8x8xbf16>
    %cst_15 = arith.constant dense<0.000000e+00> : vector<8x8xf32>
    %57 = tpu.matmul %53, %56, %cst_15 {dimension_numbers = #tpu.dot_dimension_numbers<[1], [0], [0], [1], [0, 0, 1, 1], [], []>} : vector<8x8xbf16>, vector<8x8xbf16>, vector<8x8xf32> -> vector<8x8xf32>
    %58 = vector.broadcast %14 : vector<1x8xf32> to vector<8x8xf32>
    %59 = arith.addf %57, %58 : vector<8x8xf32>
    %cst_16 = arith.constant dense<0xFF800000> : vector<8xf32>
    %60 = vector.multi_reduction <maximumf>, %59, %cst_16 [1] : vector<8x8xf32> to vector<8xf32>
    %61 = vector.shape_cast %60 : vector<8xf32> to vector<8x1xf32>
    %62 = vector.broadcast %61 : vector<8x1xf32> to vector<8x8xf32>
    %63 = arith.subf %59, %62 : vector<8x8xf32>
    %64 = math.exp %63 : vector<8x8xf32>
    %cst_17 = arith.constant dense<0.000000e+00> : vector<8xf32>
    %65 = vector.multi_reduction <add>, %64, %cst_17 [1] : vector<8x8xf32> to vector<8xf32>
    %66 = vector.shape_cast %65 : vector<8xf32> to vector<8x1xf32>
    %67 = tpu.reciprocal %66 {approx = true} : vector<8x1xf32> -> vector<8x1xf32>
    %68 = vector.broadcast %67 : vector<8x1xf32> to vector<8x8xf32>
    %69 = arith.mulf %64, %68 : vector<8x8xf32>
    %70 = arith.truncf %69 : vector<8x8xf32> to vector<8x8xbf16>
    %cst_18 = arith.constant dense<0.000000e+00> : vector<8x8xf32>
    %71 = tpu.matmul %70, %55, %cst_18 {dimension_numbers = #tpu.dot_dimension_numbers<[1], [0], [0], [1], [0, 0, 1, 1], [], []>} : vector<8x8xbf16>, vector<8x8xbf16>, vector<8x8xf32> -> vector<8x8xf32>
    %72 = vector.extract_strided_slice %9 {offsets = [0, 24], sizes = [8, 8], strides = [1, 1]} : vector<8x32xbf16> to vector<8x8xbf16>
    %73 = vector.extract_strided_slice %11 {offsets = [0, 24], sizes = [8, 8], strides = [1, 1]} : vector<8x32xbf16> to vector<8x8xbf16>
    %74 = vector.extract_strided_slice %13 {offsets = [0, 24], sizes = [8, 8], strides = [1, 1]} : vector<8x32xbf16> to vector<8x8xbf16>
    %75 = tpu.transpose %73, [1, 0] : vector<8x8xbf16> -> vector<8x8xbf16>
    %cst_19 = arith.constant dense<0.000000e+00> : vector<8x8xf32>
    %76 = tpu.matmul %72, %75, %cst_19 {dimension_numbers = #tpu.dot_dimension_numbers<[1], [0], [0], [1], [0, 0, 1, 1], [], []>} : vector<8x8xbf16>, vector<8x8xbf16>, vector<8x8xf32> -> vector<8x8xf32>
    %77 = vector.broadcast %14 : vector<1x8xf32> to vector<8x8xf32>
    %78 = arith.addf %76, %77 : vector<8x8xf32>
    %cst_20 = arith.constant dense<0xFF800000> : vector<8xf32>
    %79 = vector.multi_reduction <maximumf>, %78, %cst_20 [1] : vector<8x8xf32> to vector<8xf32>
    %80 = vector.shape_cast %79 : vector<8xf32> to vector<8x1xf32>
    %81 = vector.broadcast %80 : vector<8x1xf32> to vector<8x8xf32>
    %82 = arith.subf %78, %81 : vector<8x8xf32>
    %83 = math.exp %82 : vector<8x8xf32>
    %cst_21 = arith.constant dense<0.000000e+00> : vector<8xf32>
    %84 = vector.multi_reduction <add>, %83, %cst_21 [1] : vector<8x8xf32> to vector<8xf32>
    %85 = vector.shape_cast %84 : vector<8xf32> to vector<8x1xf32>
    %86 = tpu.reciprocal %85 {approx = true} : vector<8x1xf32> -> vector<8x1xf32>
    %87 = vector.broadcast %86 : vector<8x1xf32> to vector<8x8xf32>
    %88 = arith.mulf %83, %87 : vector<8x8xf32>
    %89 = arith.truncf %88 : vector<8x8xf32> to vector<8x8xbf16>
    %cst_22 = arith.constant dense<0.000000e+00> : vector<8x8xf32>
    %90 = tpu.matmul %89, %74, %cst_22 {dimension_numbers = #tpu.dot_dimension_numbers<[1], [0], [0], [1], [0, 0, 1, 1], [], []>} : vector<8x8xbf16>, vector<8x8xbf16>, vector<8x8xf32> -> vector<8x8xf32>
    %91 = tpu.concatenate %33, %52, %71, %90 in 1 : vector<8x8xf32>, vector<8x8xf32>, vector<8x8xf32>, vector<8x8xf32> -> vector<8x32xf32>
    %92 = vector.extract_strided_slice %7 {offsets = [8, 0], sizes = [8, 32], strides = [1, 1]} : vector<16x96xf32> to vector<8x32xf32>
    %93 = arith.truncf %92 : vector<8x32xf32> to vector<8x32xbf16>
    %94 = vector.extract_strided_slice %7 {offsets = [8, 32], sizes = [8, 32], strides = [1, 1]} : vector<16x96xf32> to vector<8x32xf32>
    %95 = arith.truncf %94 : vector<8x32xf32> to vector<8x32xbf16>
    %96 = vector.extract_strided_slice %7 {offsets = [8, 64], sizes = [8, 32], strides = [1, 1]} : vector<16x96xf32> to vector<8x32xf32>
    %97 = arith.truncf %96 : vector<8x32xf32> to vector<8x32xbf16>
    %98 = vector.extract_strided_slice %1 {offsets = [1, 0], sizes = [1, 8], strides = [1, 1]} : vector<2x8xf32> to vector<1x8xf32>
    %99 = vector.extract_strided_slice %93 {offsets = [0, 0], sizes = [8, 8], strides = [1, 1]} : vector<8x32xbf16> to vector<8x8xbf16>
    %100 = vector.extract_strided_slice %95 {offsets = [0, 0], sizes = [8, 8], strides = [1, 1]} : vector<8x32xbf16> to vector<8x8xbf16>
    %101 = vector.extract_strided_slice %97 {offsets = [0, 0], sizes = [8, 8], strides = [1, 1]} : vector<8x32xbf16> to vector<8x8xbf16>
    %102 = tpu.transpose %100, [1, 0] : vector<8x8xbf16> -> vector<8x8xbf16>
    %cst_23 = arith.constant dense<0.000000e+00> : vector<8x8xf32>
    %103 = tpu.matmul %99, %102, %cst_23 {dimension_numbers = #tpu.dot_dimension_numbers<[1], [0], [0], [1], [0, 0, 1, 1], [], []>} : vector<8x8xbf16>, vector<8x8xbf16>, vector<8x8xf32> -> vector<8x8xf32>
    %104 = vector.broadcast %98 : vector<1x8xf32> to vector<8x8xf32>
    %105 = arith.addf %103, %104 : vector<8x8xf32>
    %cst_24 = arith.constant dense<0xFF800000> : vector<8xf32>
    %106 = vector.multi_reduction <maximumf>, %105, %cst_24 [1] : vector<8x8xf32> to vector<8xf32>
    %107 = vector.shape_cast %106 : vector<8xf32> to vector<8x1xf32>
    %108 = vector.broadcast %107 : vector<8x1xf32> to vector<8x8xf32>
    %109 = arith.subf %105, %108 : vector<8x8xf32>
    %110 = math.exp %109 : vector<8x8xf32>
    %cst_25 = arith.constant dense<0.000000e+00> : vector<8xf32>
    %111 = vector.multi_reduction <add>, %110, %cst_25 [1] : vector<8x8xf32> to vector<8xf32>
    %112 = vector.shape_cast %111 : vector<8xf32> to vector<8x1xf32>
    %113 = tpu.reciprocal %112 {approx = true} : vector<8x1xf32> -> vector<8x1xf32>
    %114 = vector.broadcast %113 : vector<8x1xf32> to vector<8x8xf32>
    %115 = arith.mulf %110, %114 : vector<8x8xf32>
    %116 = arith.truncf %115 : vector<8x8xf32> to vector<8x8xbf16>
    %cst_26 = arith.constant dense<0.000000e+00> : vector<8x8xf32>
    %117 = tpu.matmul %116, %101, %cst_26 {dimension_numbers = #tpu.dot_dimension_numbers<[1], [0], [0], [1], [0, 0, 1, 1], [], []>} : vector<8x8xbf16>, vector<8x8xbf16>, vector<8x8xf32> -> vector<8x8xf32>
    %118 = vector.extract_strided_slice %93 {offsets = [0, 8], sizes = [8, 8], strides = [1, 1]} : vector<8x32xbf16> to vector<8x8xbf16>
    %119 = vector.extract_strided_slice %95 {offsets = [0, 8], sizes = [8, 8], strides = [1, 1]} : vector<8x32xbf16> to vector<8x8xbf16>
    %120 = vector.extract_strided_slice %97 {offsets = [0, 8], sizes = [8, 8], strides = [1, 1]} : vector<8x32xbf16> to vector<8x8xbf16>
    %121 = tpu.transpose %119, [1, 0] : vector<8x8xbf16> -> vector<8x8xbf16>
    %cst_27 = arith.constant dense<0.000000e+00> : vector<8x8xf32>
    %122 = tpu.matmul %118, %121, %cst_27 {dimension_numbers = #tpu.dot_dimension_numbers<[1], [0], [0], [1], [0, 0, 1, 1], [], []>} : vector<8x8xbf16>, vector<8x8xbf16>, vector<8x8xf32> -> vector<8x8xf32>
    %123 = vector.broadcast %98 : vector<1x8xf32> to vector<8x8xf32>
    %124 = arith.addf %122, %123 : vector<8x8xf32>
    %cst_28 = arith.constant dense<0xFF800000> : vector<8xf32>
    %125 = vector.multi_reduction <maximumf>, %124, %cst_28 [1] : vector<8x8xf32> to vector<8xf32>
    %126 = vector.shape_cast %125 : vector<8xf32> to vector<8x1xf32>
    %127 = vector.broadcast %126 : vector<8x1xf32> to vector<8x8xf32>
    %128 = arith.subf %124, %127 : vector<8x8xf32>
    %129 = math.exp %128 : vector<8x8xf32>
    %cst_29 = arith.constant dense<0.000000e+00> : vector<8xf32>
    %130 = vector.multi_reduction <add>, %129, %cst_29 [1] : vector<8x8xf32> to vector<8xf32>
    %131 = vector.shape_cast %130 : vector<8xf32> to vector<8x1xf32>
    %132 = tpu.reciprocal %131 {approx = true} : vector<8x1xf32> -> vector<8x1xf32>
    %133 = vector.broadcast %132 : vector<8x1xf32> to vector<8x8xf32>
    %134 = arith.mulf %129, %133 : vector<8x8xf32>
    %135 = arith.truncf %134 : vector<8x8xf32> to vector<8x8xbf16>
    %cst_30 = arith.constant dense<0.000000e+00> : vector<8x8xf32>
    %136 = tpu.matmul %135, %120, %cst_30 {dimension_numbers = #tpu.dot_dimension_numbers<[1], [0], [0], [1], [0, 0, 1, 1], [], []>} : vector<8x8xbf16>, vector<8x8xbf16>, vector<8x8xf32> -> vector<8x8xf32>
    %137 = vector.extract_strided_slice %93 {offsets = [0, 16], sizes = [8, 8], strides = [1, 1]} : vector<8x32xbf16> to vector<8x8xbf16>
    %138 = vector.extract_strided_slice %95 {offsets = [0, 16], sizes = [8, 8], strides = [1, 1]} : vector<8x32xbf16> to vector<8x8xbf16>
    %139 = vector.extract_strided_slice %97 {offsets = [0, 16], sizes = [8, 8], strides = [1, 1]} : vector<8x32xbf16> to vector<8x8xbf16>
    %140 = tpu.transpose %138, [1, 0] : vector<8x8xbf16> -> vector<8x8xbf16>
    %cst_31 = arith.constant dense<0.000000e+00> : vector<8x8xf32>
    %141 = tpu.matmul %137, %140, %cst_31 {dimension_numbers = #tpu.dot_dimension_numbers<[1], [0], [0], [1], [0, 0, 1, 1], [], []>} : vector<8x8xbf16>, vector<8x8xbf16>, vector<8x8xf32> -> vector<8x8xf32>
    %142 = vector.broadcast %98 : vector<1x8xf32> to vector<8x8xf32>
    %143 = arith.addf %141, %142 : vector<8x8xf32>
    %cst_32 = arith.constant dense<0xFF800000> : vector<8xf32>
    %144 = vector.multi_reduction <maximumf>, %143, %cst_32 [1] : vector<8x8xf32> to vector<8xf32>
    %145 = vector.shape_cast %144 : vector<8xf32> to vector<8x1xf32>
    %146 = vector.broadcast %145 : vector<8x1xf32> to vector<8x8xf32>
    %147 = arith.subf %143, %146 : vector<8x8xf32>
    %148 = math.exp %147 : vector<8x8xf32>
    %cst_33 = arith.constant dense<0.000000e+00> : vector<8xf32>
    %149 = vector.multi_reduction <add>, %148, %cst_33 [1] : vector<8x8xf32> to vector<8xf32>
    %150 = vector.shape_cast %149 : vector<8xf32> to vector<8x1xf32>
    %151 = tpu.reciprocal %150 {approx = true} : vector<8x1xf32> -> vector<8x1xf32>
    %152 = vector.broadcast %151 : vector<8x1xf32> to vector<8x8xf32>
    %153 = arith.mulf %148, %152 : vector<8x8xf32>
    %154 = arith.truncf %153 : vector<8x8xf32> to vector<8x8xbf16>
    %cst_34 = arith.constant dense<0.000000e+00> : vector<8x8xf32>
    %155 = tpu.matmul %154, %139, %cst_34 {dimension_numbers = #tpu.dot_dimension_numbers<[1], [0], [0], [1], [0, 0, 1, 1], [], []>} : vector<8x8xbf16>, vector<8x8xbf16>, vector<8x8xf32> -> vector<8x8xf32>
    %156 = vector.extract_strided_slice %93 {offsets = [0, 24], sizes = [8, 8], strides = [1, 1]} : vector<8x32xbf16> to vector<8x8xbf16>
    %157 = vector.extract_strided_slice %95 {offsets = [0, 24], sizes = [8, 8], strides = [1, 1]} : vector<8x32xbf16> to vector<8x8xbf16>
    %158 = vector.extract_strided_slice %97 {offsets = [0, 24], sizes = [8, 8], strides = [1, 1]} : vector<8x32xbf16> to vector<8x8xbf16>
    %159 = tpu.transpose %157, [1, 0] : vector<8x8xbf16> -> vector<8x8xbf16>
    %cst_35 = arith.constant dense<0.000000e+00> : vector<8x8xf32>
    %160 = tpu.matmul %156, %159, %cst_35 {dimension_numbers = #tpu.dot_dimension_numbers<[1], [0], [0], [1], [0, 0, 1, 1], [], []>} : vector<8x8xbf16>, vector<8x8xbf16>, vector<8x8xf32> -> vector<8x8xf32>
    %161 = vector.broadcast %98 : vector<1x8xf32> to vector<8x8xf32>
    %162 = arith.addf %160, %161 : vector<8x8xf32>
    %cst_36 = arith.constant dense<0xFF800000> : vector<8xf32>
    %163 = vector.multi_reduction <maximumf>, %162, %cst_36 [1] : vector<8x8xf32> to vector<8xf32>
    %164 = vector.shape_cast %163 : vector<8xf32> to vector<8x1xf32>
    %165 = vector.broadcast %164 : vector<8x1xf32> to vector<8x8xf32>
    %166 = arith.subf %162, %165 : vector<8x8xf32>
    %167 = math.exp %166 : vector<8x8xf32>
    %cst_37 = arith.constant dense<0.000000e+00> : vector<8xf32>
    %168 = vector.multi_reduction <add>, %167, %cst_37 [1] : vector<8x8xf32> to vector<8xf32>
    %169 = vector.shape_cast %168 : vector<8xf32> to vector<8x1xf32>
    %170 = tpu.reciprocal %169 {approx = true} : vector<8x1xf32> -> vector<8x1xf32>
    %171 = vector.broadcast %170 : vector<8x1xf32> to vector<8x8xf32>
    %172 = arith.mulf %167, %171 : vector<8x8xf32>
    %173 = arith.truncf %172 : vector<8x8xf32> to vector<8x8xbf16>
    %cst_38 = arith.constant dense<0.000000e+00> : vector<8x8xf32>
    %174 = tpu.matmul %173, %158, %cst_38 {dimension_numbers = #tpu.dot_dimension_numbers<[1], [0], [0], [1], [0, 0, 1, 1], [], []>} : vector<8x8xbf16>, vector<8x8xbf16>, vector<8x8xf32> -> vector<8x8xf32>
    %175 = tpu.concatenate %117, %136, %155, %174 in 1 : vector<8x8xf32>, vector<8x8xf32>, vector<8x8xf32>, vector<8x8xf32> -> vector<8x32xf32>
    %176 = tpu.concatenate %91, %175 in 0 : vector<8x32xf32>, vector<8x32xf32> -> vector<16x32xf32>
    %177 = arith.truncf %176 : vector<16x32xf32> to vector<16x32xbf16>
    %c0_39 = arith.constant 0 : index
    %c0_40 = arith.constant 0 : index
    %178 = vector.load %arg4[%c0_39, %c0_40] : memref<32x32xbf16, #tpu.memory_space<vmem>>, vector<32x32xbf16>
    %cst_41 = arith.constant dense<0.000000e+00> : vector<16x32xf32>
    %179 = tpu.matmul %177, %178, %cst_41 {dimension_numbers = #tpu.dot_dimension_numbers<[1], [0], [0], [1], [0, 0, 1, 1], [], []>} : vector<16x32xbf16>, vector<32x32xbf16>, vector<16x32xf32> -> vector<16x32xf32>
    %c0_42 = arith.constant 0 : index
    %c0_43 = arith.constant 0 : index
    %180 = vector.load %arg5[%c0_42, %c0_43] : memref<1x32xf32, #tpu.memory_space<vmem>>, vector<1x32xf32>
    %181 = vector.broadcast %180 : vector<1x32xf32> to vector<16x32xf32>
    %182 = arith.addf %179, %181 : vector<16x32xf32>
    %183 = arith.addf %182, %0 : vector<16x32xf32>
    %c0_44 = arith.constant 0 : index
    %c0_45 = arith.constant 0 : index
    %184 = vector.load %arg6[%c0_44, %c0_45] : memref<1x32xf32, #tpu.memory_space<vmem>>, vector<1x32xf32>
    %c0_46 = arith.constant 0 : index
    %c0_47 = arith.constant 0 : index
    %185 = vector.load %arg7[%c0_46, %c0_47] : memref<1x32xf32, #tpu.memory_space<vmem>>, vector<1x32xf32>
    %cst_48 = arith.constant dense<0.000000e+00> : vector<16xf32>
    %186 = vector.multi_reduction <add>, %183, %cst_48 [1] : vector<16x32xf32> to vector<16xf32>
    %187 = vector.shape_cast %186 : vector<16xf32> to vector<16x1xf32>
    %cst_49 = arith.constant 3.200000e+01 : f32
    %188 = vector.broadcast %cst_49 : f32 to vector<16x1xf32>
    %189 = arith.divf %187, %188 : vector<16x1xf32>
    %190 = vector.broadcast %189 : vector<16x1xf32> to vector<16x32xf32>
    %191 = arith.subf %183, %190 : vector<16x32xf32>
    %192 = arith.mulf %191, %191 : vector<16x32xf32>
    %cst_50 = arith.constant dense<0.000000e+00> : vector<16xf32>
    %193 = vector.multi_reduction <add>, %192, %cst_50 [1] : vector<16x32xf32> to vector<16xf32>
    %194 = vector.shape_cast %193 : vector<16xf32> to vector<16x1xf32>
    %cst_51 = arith.constant 3.200000e+01 : f32
    %195 = vector.broadcast %cst_51 : f32 to vector<16x1xf32>
    %196 = arith.divf %194, %195 : vector<16x1xf32>
    %197 = vector.broadcast %189 : vector<16x1xf32> to vector<16x32xf32>
    %198 = arith.subf %183, %197 : vector<16x32xf32>
    %cst_52 = arith.constant 9.99999974E-6 : f32
    %199 = vector.broadcast %cst_52 : f32 to vector<16x1xf32>
    %200 = arith.addf %196, %199 : vector<16x1xf32>
    %201 = math.rsqrt %200 : vector<16x1xf32>
    %202 = vector.broadcast %201 : vector<16x1xf32> to vector<16x32xf32>
    %203 = arith.mulf %198, %202 : vector<16x32xf32>
    %204 = vector.broadcast %184 : vector<1x32xf32> to vector<16x32xf32>
    %205 = arith.mulf %203, %204 : vector<16x32xf32>
    %206 = vector.broadcast %185 : vector<1x32xf32> to vector<16x32xf32>
    %207 = arith.addf %205, %206 : vector<16x32xf32>
    %208 = arith.truncf %207 : vector<16x32xf32> to vector<16x32xbf16>
    %c0_53 = arith.constant 0 : index
    %c0_54 = arith.constant 0 : index
    %209 = vector.load %arg8[%c0_53, %c0_54] : memref<32x64xbf16, #tpu.memory_space<vmem>>, vector<32x64xbf16>
    %cst_55 = arith.constant dense<0.000000e+00> : vector<16x64xf32>
    %210 = tpu.matmul %208, %209, %cst_55 {dimension_numbers = #tpu.dot_dimension_numbers<[1], [0], [0], [1], [0, 0, 1, 1], [], []>} : vector<16x32xbf16>, vector<32x64xbf16>, vector<16x64xf32> -> vector<16x64xf32>
    %c0_56 = arith.constant 0 : index
    %c0_57 = arith.constant 0 : index
    %211 = vector.load %arg9[%c0_56, %c0_57] : memref<1x64xf32, #tpu.memory_space<vmem>>, vector<1x64xf32>
    %212 = vector.broadcast %211 : vector<1x64xf32> to vector<16x64xf32>
    %213 = arith.addf %210, %212 : vector<16x64xf32>
    %cst_58 = arith.constant 0.000000e+00 : f32
    %214 = vector.broadcast %cst_58 : f32 to vector<16x64xf32>
    %215 = arith.maximumf %213, %214 : vector<16x64xf32>
    %216 = arith.truncf %215 : vector<16x64xf32> to vector<16x64xbf16>
    %c0_59 = arith.constant 0 : index
    %c0_60 = arith.constant 0 : index
    %217 = vector.load %arg10[%c0_59, %c0_60] : memref<64x32xbf16, #tpu.memory_space<vmem>>, vector<64x32xbf16>
    %cst_61 = arith.constant dense<0.000000e+00> : vector<16x32xf32>
    %218 = tpu.matmul %216, %217, %cst_61 {dimension_numbers = #tpu.dot_dimension_numbers<[1], [0], [0], [1], [0, 0, 1, 1], [], []>} : vector<16x64xbf16>, vector<64x32xbf16>, vector<16x32xf32> -> vector<16x32xf32>
    %c0_62 = arith.constant 0 : index
    %c0_63 = arith.constant 0 : index
    %219 = vector.load %arg11[%c0_62, %c0_63] : memref<1x32xf32, #tpu.memory_space<vmem>>, vector<1x32xf32>
    %220 = vector.broadcast %219 : vector<1x32xf32> to vector<16x32xf32>
    %221 = arith.addf %218, %220 : vector<16x32xf32>
    %222 = arith.addf %221, %207 : vector<16x32xf32>
    %c0_64 = arith.constant 0 : index
    %c0_65 = arith.constant 0 : index
    %223 = vector.load %arg12[%c0_64, %c0_65] : memref<1x32xf32, #tpu.memory_space<vmem>>, vector<1x32xf32>
    %c0_66 = arith.constant 0 : index
    %c0_67 = arith.constant 0 : index
    %224 = vector.load %arg13[%c0_66, %c0_67] : memref<1x32xf32, #tpu.memory_space<vmem>>, vector<1x32xf32>
    %cst_68 = arith.constant dense<0.000000e+00> : vector<16xf32>
    %225 = vector.multi_reduction <add>, %222, %cst_68 [1] : vector<16x32xf32> to vector<16xf32>
    %226 = vector.shape_cast %225 : vector<16xf32> to vector<16x1xf32>
    %cst_69 = arith.constant 3.200000e+01 : f32
    %227 = vector.broadcast %cst_69 : f32 to vector<16x1xf32>
    %228 = arith.divf %226, %227 : vector<16x1xf32>
    %229 = vector.broadcast %228 : vector<16x1xf32> to vector<16x32xf32>
    %230 = arith.subf %222, %229 : vector<16x32xf32>
    %231 = arith.mulf %230, %230 : vector<16x32xf32>
    %cst_70 = arith.constant dense<0.000000e+00> : vector<16xf32>
    %232 = vector.multi_reduction <add>, %231, %cst_70 [1] : vector<16x32xf32> to vector<16xf32>
    %233 = vector.shape_cast %232 : vector<16xf32> to vector<16x1xf32>
    %cst_71 = arith.constant 3.200000e+01 : f32
    %234 = vector.broadcast %cst_71 : f32 to vector<16x1xf32>
    %235 = arith.divf %233, %234 : vector<16x1xf32>
    %236 = vector.broadcast %228 : vector<16x1xf32> to vector<16x32xf32>
    %237 = arith.subf %222, %236 : vector<16x32xf32>
    %cst_72 = arith.constant 9.99999974E-6 : f32
    %238 = vector.broadcast %cst_72 : f32 to vector<16x1xf32>
    %239 = arith.addf %235, %238 : vector<16x1xf32>
    %240 = math.rsqrt %239 : vector<16x1xf32>
    %241 = vector.broadcast %240 : vector<16x1xf32> to vector<16x32xf32>
    %242 = arith.mulf %237, %241 : vector<16x32xf32>
    %243 = vector.broadcast %223 : vector<1x32xf32> to vector<16x32xf32>
    %244 = arith.mulf %242, %243 : vector<16x32xf32>
    %245 = vector.broadcast %224 : vector<1x32xf32> to vector<16x32xf32>
    %246 = arith.addf %244, %245 : vector<16x32xf32>
    %c0_73 = arith.constant 0 : index
    %c0_74 = arith.constant 0 : index
    %247 = vector.load %arg14[%c0_73, %c0_74] : memref<16x32xf32, #tpu.memory_space<vmem>>, vector<16x32xf32>
    tpu.vector_store %arg14[%c0_73, %c0_74], %246 {strides = array<i32>} : memref<16x32xf32, #tpu.memory_space<vmem>>, vector<16x32xf32>,
    return
  }
}

</mosaic_0001>

<bundles_post_ra>
// kernel: encoder_transformer_block.1
= control target key start
LH: loop header
LB: loop body
LE: loop exit
PB: predicated region body
PF: predicated region fallthrough
CT: control target
= control target key end

     0   :  { %19 = vsyncpa [#allocation3], 0  ;;  %s2371_s0 = inlined_call_operand.vmem [shape: f32[16,32], index: 0, kind: input, shape index: {}]   ;;  %s2372_s1 = inlined_call_operand.vmem [shape: f32[2,8], index: 1, kind: input, shape index: {}]   ;;  %s2373_s2 = inlined_call_operand.hbm [shape: bf16[32,96], index: 2, kind: input, shape index: {}]   ;;  %s2374_s3 = inlined_call_operand.hbm [shape: f32[1,96], index: 3, kind: input, shape index: {}]   ;;  %s2375_s4 = inlined_call_operand.hbm [shape: bf16[32,32], index: 4, kind: input, shape index: {}]   ;;  %s2376_s5 = inlined_call_operand.hbm [shape: f32[1,32], index: 5, kind: input, shape index: {}]   ;;  %s2377_s6 = inlined_call_operand.vmem [shape: f32[1,32], index: 6, kind: input, shape index: {}, may-alias: {6,12}]   ;;  %s2378_s7 = inlined_call_operand.vmem [shape: f32[1,32], index: 7, kind: input, shape index: {}, may-alias: {7,13}]   ;;  %s2379_s8 = inlined_call_operand.vmem [shape: bf16[32,64], index: 8, kind: input, shape index: {}]   ;;  %s2380_s9 = inlined_call_operand.hbm [shape: f32[1,64], index: 9, kind: input, shape index: {}]   ;;  %s2381_s10 = inlined_call_operand.vmem [shape: bf16[64,32], index: 10, kind: input, shape index: {}]   ;;  %s2382_s11 = inlined_call_operand.hbm [shape: f32[1,32], index: 11, kind: input, shape index: {}]   ;;  %s2383_s12 = inlined_call_operand.vmem [shape: f32[1,32], index: 12, kind: input, shape index: {}, may-alias: {6,12}]   ;;  %s2384_s13 = inlined_call_operand.vmem [shape: f32[1,32], index: 13, kind: input, shape index: {}, may-alias: {7,13}]   ;;  %s2385_s14 = inlined_call_operand.hbm [shape: f32[16,32], index: 14, kind: output, shape index: {}]  }
   0x1   :  { %20 = vsyncpa [#allocation6], 0 }
   0x2   :  { %21 = vsyncpa [#allocation9], 0 }
   0x3   :  { %22 = vsyncpa [#allocation12], 0 }
   0x4   :  { %23 = vsyncpa [#allocation4], 0  ;;  %s1925_s29 = smov [#allocation5]   ;;  %s1926_s15 = smov [#allocation8]  }
   0x5   :  { %s46_s30 = sshll.u32 %s1925_s29, 4  ;;  %s68_s16 = sshll.u32 %s1926_s15, 4  ;;  %s47_s30 = int_to_ptr.vmem [resolvable:$true] %s46_s30  ;;  %s69_s16 = int_to_ptr.vmem [resolvable:$true] %s68_s16 }
   0x6   :  { %s1761_s19 = scalar_lea.hbm %s2374_s3, 16 }
   0x7   :  { %p1762_p0 = scmp.ne.s32.totalorder %s2374_s3, %s1761_s19  ;;  %p1765_p1 = scmp.lt.u32.totalorder %s1761_s19, %s2374_s3 }
   0x9   :  { %p1767_p2 = pnand %p1765_p1, %p1762_p0 }
   0xb   :  { %1770 = shalt.err (!%p1767_p2)
}
   0xc   :  { %s1771_s24 = scalar_lea.vmem %s47_s30, 16  ;;  %s1775_s25 = scalar_lea.vmem %s47_s30, 32 }
   0xd   :  { %p1772_p3 = scmp.ne.s32.totalorder %s47_s30, %s1771_s24  ;;  %p1776_p4 = scmp.lt.s32.totalorder %s47_s30, %s47_s30 }
   0xe   :  { %p1777_p5 = scmp.lt.s32.totalorder %s1775_s25, %s1771_s24 }
  0x10   :  { %p1778_p6 = por %p1777_p5, %p1776_p4 }
  0x12   :  { %p1779_p7 = pnand %p1778_p6, %p1772_p3 }
  0x14   :  { %1782 = shalt.err (!%p1779_p7)
}
  0x15   :  { %49 = dma.hbm_to_vmem [thread:$0]  %s2374_s3, 16, %s47_s30, [#allocation6]  }
  0x16   :  { %s1783_s15 = scalar_lea.hbm %s2376_s5, 16 }
  0x17   :  { %p1784_p8 = scmp.ne.s32.totalorder %s2376_s5, %s1783_s15  ;;  %p1787_p9 = scmp.lt.u32.totalorder %s1783_s15, %s2376_s5 }
  0x19   :  { %p1789_p10 = pnand %p1787_p9, %p1784_p8 }
  0x1b   :  { %1792 = shalt.err (!%p1789_p10)
}
  0x1c   :  { %s1793_s21 = scalar_lea.vmem %s69_s16, 16  ;;  %s1797_s22 = scalar_lea.vmem %s69_s16, 32 }
  0x1d   :  { %p1794_p11 = scmp.ne.s32.totalorder %s69_s16, %s1793_s21  ;;  %p1798_p12 = scmp.lt.s32.totalorder %s69_s16, %s69_s16 }
  0x1e   :  { %p1799_p13 = scmp.lt.s32.totalorder %s1797_s22, %s1793_s21 }
  0x20   :  { %p1800_p0 = por %p1799_p13, %p1798_p12 }
  0x22   :  { %p1801_p1 = pnand %p1800_p0, %p1794_p11 }
  0x24   :  { %1804 = shalt.err (!%p1801_p1)
}
  0x25   :  { %71 = dma.hbm_to_vmem [thread:$0]  %s2376_s5, 16, %s69_s16, [#allocation9]  }
  0x26   :  { %s1927_s23 = smov [#allocation2]   ;;  %s1805_s27 = scalar_lea.hbm %s2373_s2, 256 }
  0x27   :  { %s33_s24 = sshll.u32 %s1927_s23, 4  ;;  %p1806_p2 = scmp.ne.s32.totalorder %s2373_s2, %s1805_s27  ;;  %s34_s24 = int_to_ptr.vmem [resolvable:$true] %s33_s24 }
  0x28   :  { %p1809_p3 = scmp.lt.u32.totalorder %s1805_s27, %s2373_s2 }
  0x2a   :  { %p1811_p4 = pnand %p1809_p3, %p1806_p2 }
  0x2c   :  { %1814 = shalt.err (!%p1811_p4)
}
  0x2d   :  { %s1815_s18 = scalar_lea.vmem %s34_s24, 256  ;;  %p1820_p6 = scmp.lt.s32.totalorder %s34_s24, %s34_s24 }
  0x2e   :  { %p1816_p5 = scmp.ne.s32.totalorder %s34_s24, %s1815_s18  ;;  %p1821_p7 = scmp.lt.s32.totalorder %s1815_s18, %s1815_s18 }
  0x30   :  { %p1822_p8 = por %p1821_p7, %p1820_p6 }
  0x32   :  { %p1823_p9 = pnand %p1822_p8, %p1816_p5 }
  0x34   :  { %1826 = shalt.err (!%p1823_p9)
}
  0x35   :  { %s1928_s5 = smov 64   ;;  %s1929_s16 = smov 4  }
  0x36   :  { %39 = dma.hbm_to_vmem [thread:$0]  %s2373_s2, 256, %s34_s24, [#allocation3], %s1928_s5, %s1928_s5, %s1929_s16  }
  0x37   :  { %s1930_s21 = smov [#allocation7]   ;;  %s1931_s3 = smov [#allocation10]  }
  0x38   :  { %s55_s22 = sshll.u32 %s1930_s21, 4  ;;  %s84_s30 = sshll.u32 %s1931_s3, 4  ;;  %s56_s22 = int_to_ptr.vmem [resolvable:$true] %s55_s22  ;;  %s85_s30 = int_to_ptr.vmem [resolvable:$true] %s84_s30 }
  0x39   :  { %s1827_s26 = scalar_lea.hbm %s2375_s4, 256 }
  0x3a   :  { %p1828_p10 = scmp.ne.s32.totalorder %s2375_s4, %s1827_s26  ;;  %p1831_p11 = scmp.lt.u32.totalorder %s1827_s26, %s2375_s4 }
  0x3c   :  { %p1833_p12 = pnand %p1831_p11, %p1828_p10 }
  0x3e   :  { %1836 = shalt.err (!%p1833_p12)
}
  0x3f   :  { %s1837_s2 = scalar_lea.vmem %s56_s22, 256  ;;  %p1842_p0 = scmp.lt.s32.totalorder %s56_s22, %s56_s22 }
  0x40   :  { %p1838_p13 = scmp.ne.s32.totalorder %s56_s22, %s1837_s2  ;;  %p1843_p1 = scmp.lt.s32.totalorder %s1837_s2, %s1837_s2 }
  0x42   :  { %p1844_p2 = por %p1843_p1, %p1842_p0 }
  0x44   :  { %p1845_p3 = pnand %p1844_p2, %p1838_p13 }
  0x46   :  { %1848 = shalt.err (!%p1845_p3)
}
  0x47   :  { %61 = dma.hbm_to_vmem [thread:$0]  %s2375_s4, 256, %s56_s22, [#allocation6], %s1928_s5, %s1928_s5, %s1929_s16  }
  0x48   :  { %s1849_s20 = scalar_lea.hbm %s2380_s9, 16 }
  0x49   :  { %p1850_p4 = scmp.ne.s32.totalorder %s2380_s9, %s1849_s20  ;;  %p1853_p5 = scmp.lt.u32.totalorder %s1849_s20, %s2380_s9 }
  0x4b   :  { %p1855_p6 = pnand %p1853_p5, %p1850_p4 }
  0x4d   :  { %1858 = shalt.err (!%p1855_p6)
}
  0x4e   :  { %s1859_s26 = scalar_lea.vmem %s85_s30, 16  ;;  %s1863_s27 = scalar_lea.vmem %s85_s30, 32 }
  0x4f   :  { %p1860_p7 = scmp.ne.s32.totalorder %s85_s30, %s1859_s26  ;;  %p1864_p8 = scmp.lt.s32.totalorder %s85_s30, %s85_s30 }
  0x50   :  { %p1865_p9 = scmp.lt.s32.totalorder %s1863_s27, %s1859_s26 }
  0x52   :  { %p1866_p10 = por %p1865_p9, %p1864_p8 }
  0x54   :  { %p1867_p11 = pnand %p1866_p10, %p1860_p7 }
  0x56   :  { %1870 = shalt.err (!%p1867_p11)
}
  0x57   :  { %87 = dma.hbm_to_vmem [thread:$0]  %s2380_s9, 16, %s85_s30, [#allocation9]  }
  0x58   :  { %s1932_s22 = smov [#allocation11]   ;;  %s1871_s2 = scalar_lea.hbm %s2382_s11, 16 }
  0x59   :  { %s96_s28 = sshll.u32 %s1932_s22, 4  ;;  %p1872_p12 = scmp.ne.s32.totalorder %s2382_s11, %s1871_s2  ;;  %s97_s28 = int_to_ptr.vmem [resolvable:$true] %s96_s28 }
  0x5a   :  { %p1875_p13 = scmp.lt.u32.totalorder %s1871_s2, %s2382_s11 }
  0x5c   :  { %p1877_p0 = pnand %p1875_p13, %p1872_p12 }
  0x5e   :  { %1880 = shalt.err (!%p1877_p0)
}
  0x5f   :  { %s1881_s20 = scalar_lea.vmem %s97_s28, 16  ;;  %s1885_s9 = scalar_lea.vmem %s97_s28, 32 }
  0x60   :  { %p1882_p1 = scmp.ne.s32.totalorder %s97_s28, %s1881_s20  ;;  %p1886_p2 = scmp.lt.s32.totalorder %s97_s28, %s97_s28 }
  0x61   :  { %p1887_p3 = scmp.lt.s32.totalorder %s1885_s9, %s1881_s20 }
  0x63   :  { %p1888_p4 = por %p1887_p3, %p1886_p2 }
  0x65   :  { %p1889_p5 = pnand %p1888_p4, %p1882_p1 }
  0x67   :  { %1892 = shalt.err (!%p1889_p5)
}
  0x68   :  { %99 = dma.hbm_to_vmem [thread:$0]  %s2382_s11, 16, %s97_s28, [#allocation12]  }
  0x69   :  { %1915 = dma.done.wait [#allocation3], 256  }
  0x6a   :  { %1916 = vsyncadd [#allocation3], 4294967040 }
  0x6b   :  { %1917 = dma.done.wait [#allocation6], 272  }
  0x6c   :  { %1918 = vsyncadd [#allocation6], 4294967024 }
  0x6d   :  { %1919 = dma.done.wait [#allocation9], 32  }
  0x6e   :  { %1920 = vsyncadd [#allocation9], 4294967264 }
  0x6f   :  { %1921 = dma.done.wait [#allocation12], 16  }
  0x70   :  { %1922 = vsyncadd [#allocation12], 4294967280  ;;  %v1933_v0 = vmov 0.0   ;;  %vm1934_vm0 = vmmov 0   ;;  %v1711_v1 = vld [vmem:[#allocation2] sm:$0xff]   ;;  %v1712_v2 = vld [vmem:[#allocation2 + $0x8] sm:$0xff]   ;;  %v196_v37 = vlaneseq }
  0x71   :  { %1539 = vmatprep.subr.bf16.mxu0 %v1933_v0  ;;  %1543 = vmatprep.mubr.msk.bf16.mxu0 %vm1934_vm0, %v1933_v0  ;;  %v2110_v3 = vld [vmem:[%s2371_s0] sm:$0xff]  ;;  %v2115_v4 = vld [vmem:[%s2371_s0 + $0x8] sm:$0xff]  ;;  %vm150_vm1 = vcmask 261120   ;;  %v1455_v6 = vld [vmem:[#allocation5] ss:$0 sm:$0xff]  ;;  %s1935_s0 = smov 120  }
  0x72   :  { %1547 = vmatprep.subr.bf16.mxu1 %v1933_v0  ;;  %1549 = vmatprep.mubr.msk.bf16.mxu1 %vm1934_vm0, %v1933_v0  ;;  %v126_v5 = vpack.c.bf16 %v2115_v4, %v2110_v3  ;;  %s1936_s26 = smov 96   ;;  %s1937_s27 = smov 80   ;;  %vm203_vm2 = vcmask 64512   ;;  %v197_v38 = vshrl.u32 %v196_v37, 7  ;;  %v125_v40 = vld [vmem:[%s2372_s1] sm:$0x3] }
  0x73   :  { %1540 = vmatpush3.bf16.msra.mxu0 %v1711_v1  ;;  %s1938_s4 = smov 88   ;;  %s1939_s16 = smov 72   ;;  %vm267_vm3 = vcmask 1043456   ;;  %vm654_vm4 = vcmask 130048   ;;  %vm656_vm5 = vcmask 195584   ;;  %vm1342_vm6 = vcmask 523264  }
  0x74   :  { %1541 = vmatprep.subr.bf16.mxu0 %v1933_v0  ;;  %s1940_s22 = smov 112   ;;  %s1941_s28 = smov 104   ;;  %v198_v39 = vsub.s32 0, %v197_v38  ;;  %v661_v63 = vsub.s32 1, %v197_v38 }
  0x75   :  { %s1942_s1 = smov 56   ;;  %s1943_s2 = smov 48  }
  0x76   :  { %v199_v41 = vrot.slane %v125_v40, %v198_v39  ;;  %s1944_s24 = smov 40   ;;  %s1946_s17 = smov 16  }
  0x77   :  { %1542 = vmatpush3.bf16.msra.mxu0 %v1712_v2  ;;  %s1947_s18 = smov 24   ;;  %s1948_s29 = smov [#allocation13]  }
  0x78   :  { %1553 = vmatprep.subr.bf16.mxu0 %v1933_v0  ;;  %s1440_s15 = sshll.u32 %s1948_s29, 4  ;;  %s1441_s15 = int_to_ptr.vmem [resolvable:$true] %s1440_s15 }
  0x79   :  { %p1898_p7 = scmp.lt.s32.totalorder %s1441_s15, %s1441_s15 }
  0x7a   :  { %1544 = vmatmul.mubr.msk.bf16.vlgmr.msra.gmra.mrb[0].mxu0 %vm150_vm1, %v126_v5 }
  0x7b   :  { %1555 = vmatprep.mubr.msk.bf16.mxu0 %vm1934_vm0, %v1933_v0 }
 0x14d   :  { %v188_v7 = vpop.f32.mrb[0].mxu0 }
 0x14e   :  { %v189_v8 = vadd.f32 %v1455_v6, %v188_v7  ;;  %v1545_v9 = vpop.f32.mrb[1].mxu0 }
 0x14f   :  { %v191_v10 = vpop.f32.mrb[2].mxu0 }
 0x150   :  { %v2124_v11 = vpack.c.bf16 %v189_v8, %v189_v8  ;;  %v1546_v12 = vpop.f32.mrb[3].mxu0  ;;  %v192_v13 = vadd.f32 %v1455_v6, %v191_v10  ;;  %v662_v6 = vrot.slane %v125_v40, %v661_v63 }
 0x152   :  { %311 = vrot.lane.b32.xlu1 %v2124_v11, %s1935_s0  ;;  %201 = vrot.lane.b32.xlu0 %v2124_v11, %s1936_s26  ;;  %v2132_v14 = vpack.c.bf16 %v192_v13, %v192_v13 }
 0x156   :  { %423 = vrot.lane.b32.xlu1 %v2124_v11, %s1937_s27  ;;  %313 = vrot.lane.b32.xlu0 %v2124_v11, %s1938_s4 }
 0x15a   :  { %533 = vrot.lane.b32.xlu1 %v2124_v11, %s1939_s16  ;;  %421 = vrot.lane.b32.xlu0 %v2124_v11, %s1940_s22 }
 0x15e   :  { %531 = vrot.lane.b32.xlu0 %v2124_v11, %s1941_s28  ;;  %664 = vrot.lane.b32.xlu1 %v2132_v14, %s1936_s26 }
 0x162   :  { %774 = vrot.lane.b32.xlu0 %v2132_v14, %s1938_s4  ;;  %772 = vrot.lane.b32.xlu1 %v2132_v14, %s1935_s0 }
 0x166   :  { %884 = vrot.lane.b32.xlu0 %v2132_v14, %s1937_s27  ;;  %882 = vrot.lane.b32.xlu1 %v2132_v14, %s1940_s22 }
 0x16a   :  { %994 = vrot.lane.b32.xlu0 %v2132_v14, %s1939_s16  ;;  %992 = vrot.lane.b32.xlu1 %v2132_v14, %s1941_s28 }
 0x1c4   :  { %v202_v15 = vpop.permute.xlu0 %201  ;;  %v312_v18 = vpop.permute.xlu1 %311 }
 0x1c5   :  { %v208_v16 = vsel %vm203_vm2, %v202_v15, 0 }
 0x1c6   :  { %1548 = vmatpush3.bf16.xpose.msra.mxu1 %v208_v16 }
 0x1c7   :  { %1559 = vmatprep.subr.bf16.mxu1 %v1933_v0 }
 0x1c8   :  { %v314_v17 = vpop.permute.xlu0 %313  ;;  %v424_v20 = vpop.permute.xlu1 %423 }
 0x1c9   :  { %v319_v19 = vsel %vm203_vm2, %v314_v17, 0  ;;  %v429_v21 = vsel %vm203_vm2, %v424_v20, 0 }
 0x1cc   :  { %v534_v22 = vpop.permute.xlu1 %533  ;;  %v422_v23 = vpop.permute.xlu0 %421 }
 0x1cd   :  { %1550 = vmatmul.mubr.msk.bf16.vlgmr.msra.gmra.mrb[0].mxu1 %vm203_vm2, %v2124_v11  ;;  %v539_v24 = vsel %vm203_vm2, %v534_v22, 0 }
 0x1ce   :  { %1560 = vmatpush3.bf16.xpose.msra.mxu1 %v319_v19  ;;  %1561 = vmatprep.mubr.msk.bf16.mxu1 %vm1934_vm0, %v1933_v0 }
 0x1cf   :  { %1571 = vmatprep.subr.bf16.mxu1 %v1933_v0 }
 0x1d0   :  { %v665_v25 = vpop.permute.xlu1 %664  ;;  %v532_v26 = vpop.permute.xlu0 %531 }
 0x1d1   :  { %v670_v27 = vsel %vm203_vm2, %v665_v25, 0 }
 0x1d4   :  { %v775_v28 = vpop.permute.xlu0 %774  ;;  %v773_v31 = vpop.permute.xlu1 %772 }
 0x1d5   :  { %1562 = vmatmul.mubr.msk.bf16.vlgmr.msra.gmra.mrb[4].mxu1 %vm203_vm2, %v312_v18  ;;  %v780_v29 = vsel %vm203_vm2, %v775_v28, 0 }
 0x1d6   :  { %1572 = vmatpush3.bf16.xpose.msra.mxu1 %v429_v21  ;;  %1573 = vmatprep.mubr.msk.bf16.mxu1 %vm1934_vm0, %v1933_v0 }
 0x1d7   :  { %1583 = vmatprep.subr.bf16.mxu1 %v1933_v0 }
 0x1d8   :  { %v885_v30 = vpop.permute.xlu0 %884  ;;  %v883_v34 = vpop.permute.xlu1 %882 }
 0x1d9   :  { %v890_v32 = vsel %vm203_vm2, %v885_v30, 0 }
 0x1dc   :  { %v995_v33 = vpop.permute.xlu0 %994  ;;  %v993_v36 = vpop.permute.xlu1 %992 }
 0x1dd   :  { %1574 = vmatmul.mubr.msk.bf16.vlgmr.msra.gmra.mrb[8].mxu1 %vm203_vm2, %v422_v23  ;;  %v1000_v35 = vsel %vm203_vm2, %v995_v33, 0 }
 0x1de   :  { %1584 = vmatpush3.bf16.xpose.msra.mxu1 %v539_v24  ;;  %1585 = vmatprep.mubr.msk.bf16.mxu1 %vm1934_vm0, %v1933_v0 }
 0x1df   :  { %1595 = vmatprep.subr.bf16.mxu1 %v1933_v0 }
 0x1e5   :  { %1586 = vmatmul.mubr.msk.bf16.vlgmr.msra.gmra.mrb[12].mxu1 %vm203_vm2, %v532_v26 }
 0x1e6   :  { %1596 = vmatpush3.bf16.xpose.msra.mxu1 %v670_v27  ;;  %1597 = vmatprep.mubr.msk.bf16.mxu1 %vm1934_vm0, %v1933_v0 }
 0x1e7   :  { %1607 = vmatprep.subr.bf16.mxu1 %v1933_v0 }
 0x1ed   :  { %1598 = vmatmul.mubr.msk.bf16.vlgmr.msra.gmra.mrb[16].mxu1 %vm203_vm2, %v2132_v14 }
 0x1ee   :  { %1608 = vmatpush3.bf16.xpose.msra.mxu1 %v780_v29  ;;  %1609 = vmatprep.mubr.msk.bf16.mxu1 %vm1934_vm0, %v1933_v0 }
 0x1ef   :  { %1619 = vmatprep.subr.bf16.mxu1 %v1933_v0 }
 0x1f5   :  { %1610 = vmatmul.mubr.msk.bf16.vlgmr.msra.gmra.mrb[20].mxu1 %vm203_vm2, %v773_v31 }
 0x1f6   :  { %1620 = vmatpush3.bf16.xpose.msra.mxu1 %v890_v32  ;;  %1621 = vmatprep.mubr.msk.bf16.mxu1 %vm1934_vm0, %v1933_v0 }
 0x1f7   :  { %1631 = vmatprep.subr.bf16.mxu1 %v1933_v0 }
 0x1fd   :  { %1622 = vmatmul.mubr.msk.bf16.vlgmr.msra.gmra.mrb[24].mxu1 %vm203_vm2, %v883_v34 }
 0x1fe   :  { %1632 = vmatpush3.bf16.xpose.msra.mxu1 %v1000_v35  ;;  %1633 = vmatprep.mubr.msk.bf16.mxu1 %vm1934_vm0, %v1933_v0 }
 0x1ff   :  { %1643 = vmatprep.subr.bf16.mxu1 %v1933_v0 }
 0x205   :  { %1634 = vmatmul.mubr.msk.bf16.vlgmr.msra.gmra.mrb[28].mxu1 %vm203_vm2, %v993_v36 }
 0x206   :  { %1647 = vmatprep.mubr.msk.bf16.mxu1 %vm1934_vm0, %v1933_v0 }
 0x2a0   :  { %v244_v42 = vpop.f32.mrb[0].mxu1 }
 0x2a1   :  { %v245_v43 = vadd.f32 %v244_v42, %v199_v41  ;;  %v1551_v44 = vpop.f32.mrb[1].mxu1 }
 0x2a2   :  { %v247_v45 = vpop.f32.mrb[2].mxu1 }
 0x2a3   :  { %v1552_v46 = vpop.f32.mrb[3].mxu1  ;;  %v250_v47 = vsel %vm203_vm2, %v245_v43, -inf }
 0x2a4   :  { %251 = vmax.xlane.f32.xlu0 %v250_v47 }
 0x2a8   :  { %v355_v48 = vpop.f32.mrb[4].mxu1 }
 0x2a9   :  { %v356_v49 = vadd.f32 %v355_v48, %v199_v41  ;;  %v1563_v50 = vpop.f32.mrb[5].mxu1 }
 0x2aa   :  { %v358_v51 = vpop.f32.mrb[6].mxu1 }
 0x2ab   :  { %v1564_v52 = vpop.f32.mrb[7].mxu1  ;;  %v361_v53 = vsel %vm203_vm2, %v356_v49, -inf }
 0x2ac   :  { %362 = vmax.xlane.f32.xlu1 %v361_v53 }
 0x2b0   :  { %v465_v54 = vpop.f32.mrb[8].mxu1 }
 0x2b1   :  { %v466_v55 = vadd.f32 %v465_v54, %v199_v41  ;;  %v1575_v56 = vpop.f32.mrb[9].mxu1 }
 0x2b2   :  { %v468_v57 = vpop.f32.mrb[10].mxu1 }
 0x2b3   :  { %v1576_v58 = vpop.f32.mrb[11].mxu1  ;;  %v471_v59 = vsel %vm203_vm2, %v466_v55, -inf }
 0x2b4   :  { %472 = vmax.xlane.f32.xlu0 %v471_v59 }
 0x2b8   :  { %v575_v60 = vpop.f32.mrb[12].mxu1 }
 0x2b9   :  { %v2190_v61 = vadd.f32 %v575_v60, %v199_v41  ;;  %v1587_v62 = vpop.f32.mrb[13].mxu1 }
 0x2ba   :  { %v578_v1 = vpop.f32.mrb[14].mxu1 }
 0x2bb   :  { %v1588_v2 = vpop.f32.mrb[15].mxu1  ;;  %v581_v5 = vsel %vm203_vm2, %v2190_v61, -inf }
 0x2bc   :  { %582 = vmax.xlane.f32.xlu0 %v581_v5 }
 0x2c0   :  { %v706_v7 = vpop.f32.mrb[16].mxu1 }
 0x2c1   :  { %v2194_v8 = vadd.f32 %v706_v7, %v662_v6  ;;  %v1599_v9 = vpop.f32.mrb[17].mxu1 }
 0x2c2   :  { %v709_v10 = vpop.f32.mrb[18].mxu1 }
 0x2c3   :  { %v1600_v12 = vpop.f32.mrb[19].mxu1  ;;  %v712_v13 = vsel %vm203_vm2, %v2194_v8, -inf }
 0x2c4   :  { %713 = vmax.xlane.f32.xlu1 %v712_v13 }
 0x2c8   :  { %v816_v15 = vpop.f32.mrb[20].mxu1 }
 0x2c9   :  { %v2198_v16 = vadd.f32 %v816_v15, %v662_v6  ;;  %v1611_v17 = vpop.f32.mrb[21].mxu1 }
 0x2ca   :  { %v819_v18 = vpop.f32.mrb[22].mxu1 }
 0x2cb   :  { %v1612_v19 = vpop.f32.mrb[23].mxu1  ;;  %v822_v20 = vsel %vm203_vm2, %v2198_v16, -inf }
 0x2cc   :  { %823 = vmax.xlane.f32.xlu0 %v822_v20 }
 0x2d0   :  { %v926_v21 = vpop.f32.mrb[24].mxu1 }
 0x2d1   :  { %v927_v22 = vadd.f32 %v926_v21, %v662_v6  ;;  %v1623_v23 = vpop.f32.mrb[25].mxu1 }
 0x2d2   :  { %v929_v24 = vpop.f32.mrb[26].mxu1 }
 0x2d3   :  { %v1624_v25 = vpop.f32.mrb[27].mxu1  ;;  %v932_v26 = vsel %vm203_vm2, %v927_v22, -inf }
 0x2d4   :  { %933 = vmax.xlane.f32.xlu1 %v932_v26 }
 0x2d8   :  { %v1036_v27 = vpop.f32.mrb[28].mxu1 }
 0x2d9   :  { %v1635_v28 = vpop.f32.mrb[29].mxu1  ;;  %v2207_v31 = vadd.f32 %v1036_v27, %v662_v6 }
 0x2da   :  { %v1039_v29 = vpop.f32.mrb[30].mxu1 }
 0x2db   :  { %v1636_v30 = vpop.f32.mrb[31].mxu1  ;;  %v1042_v32 = vsel %vm203_vm2, %v2207_v31, -inf }
 0x2e2   :  { %373 = vrot.lane.b32.xlu0 %v2124_v11, %s1942_s1 }
 0x2e5   :  { %262 = vrot.lane.b32.xlu1 %v2124_v11, %s1928_s5 }
 0x301   :  { %1043 = vmax.xlane.f32.xlu0 %v1042_v32 }
 0x331   :  { %v252_v33 = vpop.xlane.xlu0 %251 }
 0x332   :  { %v253_v34 = vsub.f32 %v245_v43, %v252_v33 }
 0x334   :  { %v254_v35 = vmul.f32 1.442695, %v253_v34 }
 0x336   :  { %1721 = vpow2.f32 %v254_v35 }
 0x339   :  { %v363_v36 = vpop.xlane.xlu1 %362 }
 0x33a   :  { %v364_v37 = vsub.f32 %v356_v49, %v363_v36 }
 0x33c   :  { %v365_v38 = vmul.f32 1.442695, %v364_v37 }
 0x33e   :  { %1723 = vpow2.f32 %v365_v38 }
 0x340   :  { %v2211_v39 = vpop.eup %1721 }
 0x341   :  { %v473_v40 = vpop.xlane.xlu0 %472  ;;  %v256_v41 = vsel %vm203_vm2, %v2211_v39, 0.0 }
 0x342   :  { %v474_v42 = vsub.f32 %v466_v55, %v473_v40  ;;  %257 = vadd.xlane.f32.xlu1 %v256_v41 }
 0x344   :  { %v475_v44 = vmul.f32 1.442695, %v474_v42 }
 0x346   :  { %1725 = vpow2.f32 %v475_v44 }
 0x348   :  { %v2215_v45 = vpop.eup %1723 }
 0x349   :  { %v367_v43 = vsel %vm203_vm2, %v2215_v45, 0.0  ;;  %v583_v51 = vpop.xlane.xlu0 %582 }
 0x34a   :  { %368 = vadd.xlane.f32.xlu0 %v367_v43  ;;  %v584_v53 = vsub.f32 %v2190_v61, %v583_v51 }
 0x34c   :  { %v585_v54 = vmul.f32 1.442695, %v584_v53 }
 0x34e   :  { %1727 = vpow2.f32 %v585_v54 }
 0x350   :  { %v2219_v46 = vpop.eup %1725 }
 0x351   :  { %v477_v47 = vsel %vm203_vm2, %v2219_v46, 0.0  ;;  %v714_v48 = vpop.xlane.xlu1 %713 }
 0x352   :  { %478 = vadd.xlane.f32.xlu1 %v477_v47  ;;  %v715_v55 = vsub.f32 %v2194_v8, %v714_v48 }
 0x354   :  { %v716_v58 = vmul.f32 1.442695, %v715_v55 }
 0x356   :  { %1729 = vpow2.f32 %v716_v58 }
 0x358   :  { %v1728_v62 = vpop.eup %1727 }
 0x359   :  { %v824_v56 = vpop.xlane.xlu0 %823  ;;  %v587_v63 = vsel %vm203_vm2, %v1728_v62, 0.0 }
 0x35a   :  { %v825_v57 = vsub.f32 %v2198_v16, %v824_v56 }
 0x35d   :  { %v374_v8 = vpop.permute.xlu0 %373 }
 0x35e   :  { %v379_v21 = vsel %vm267_vm3, %v374_v8, 0 }
 0x360   :  { %483 = vrot.lane.b32.xlu0 %v2124_v11, %s1943_s2  ;;  %v2233_v1 = vpop.eup %1729 }
 0x361   :  { %v934_v49 = vpop.xlane.xlu1 %933  ;;  %v718_v2 = vsel %vm203_vm2, %v2233_v1, 0.0 }
 0x362   :  { %v935_v59 = vsub.f32 %v927_v22, %v934_v49 }
 0x363   :  { %593 = vrot.lane.b32.xlu1 %v2124_v11, %s1944_s24  ;;  %v826_v11 = vmul.f32 1.442695, %v825_v57 }
 0x364   :  { %v936_v60 = vmul.f32 1.442695, %v935_v59 }
 0x365   :  { %v263_v50 = vpop.permute.xlu1 %262  ;;  %1731 = vpow2.f32 %v826_v11 }
 0x366   :  { %v269_v52 = vsel %vm267_vm3, %v263_v50, 0  ;;  %1733 = vpow2.f32 %v936_v60 }
 0x367   :  { %1554 = vmatpush3.bf16.msra.mxu0 %v269_v52 }
 0x368   :  { %1565 = vmatprep.subr.bf16.mxu0 %v1933_v0 }
 0x36f   :  { %v2235_v61 = vpop.eup %1731 }
 0x370   :  { %v2239_v5 = vpop.eup %1733  ;;  %v828_v6 = vsel %vm203_vm2, %v2235_v61, 0.0 }
 0x371   :  { %v938_v7 = vsel %vm203_vm2, %v2239_v5, 0.0 }
 0x37f   :  { %588 = vadd.xlane.f32.xlu0 %v587_v63 }
 0x383   :  { %719 = vadd.xlane.f32.xlu0 %v718_v2 }
 0x387   :  { %829 = vadd.xlane.f32.xlu1 %v828_v6  ;;  %939 = vadd.xlane.f32.xlu0 %v938_v7 }
 0x38e   :  { %v1044_v9 = vpop.xlane.xlu0 %1043 }
 0x38f   :  { %v1045_v10 = vsub.f32 %v2207_v31, %v1044_v9 }
 0x391   :  { %v1046_v12 = vmul.f32 1.442695, %v1045_v10 }
 0x393   :  { %1735 = vpow2.f32 %v1046_v12 }
 0x398   :  { %834 = vrot.lane.b32.xlu1 %v2132_v14, %s1942_s1  ;;  %s1893_s1 = scalar_lea.vmem %s1441_s15, 256 }
 0x399   :  { %p1894_p6 = scmp.ne.s32.totalorder %s1441_s15, %s1893_s1  ;;  %p1899_p8 = scmp.lt.s32.totalorder %s1893_s1, %s1893_s1 }
 0x39b   :  { %p1900_p9 = por %p1899_p8, %p1898_p7 }
 0x39c   :  { %944 = vrot.lane.b32.xlu1 %v2132_v14, %s1943_s2 }
 0x39d   :  { %v2250_v13 = vpop.eup %1735  ;;  %p1901_p10 = pnand %p1900_p9, %p1894_p6 }
 0x39e   :  { %v1048_v15 = vsel %vm203_vm2, %v2250_v13, 0.0 }
 0x39f   :  { %1049 = vadd.xlane.f32.xlu0 %v1048_v15 }
 0x3a0   :  { %1054 = vrot.lane.b32.xlu1 %v2132_v14, %s1944_s24 }
 0x3b5   :  { %724 = vrot.lane.b32.xlu0 %v2132_v14, %s1928_s5  ;;  %s1945_s5 = smov 8  }
 0x3cf   :  { %v258_v16 = vpop.xlane.xlu1 %257 }
 0x3d0   :  { %1737 = vrcp.f32 %v258_v16 }
 0x3d7   :  { %v369_v17 = vpop.xlane.xlu0 %368 }
 0x3d8   :  { %1739 = vrcp.f32 %v369_v17 }
 0x3da   :  { %v1738_v18 = vpop.eup %1737 }
 0x3db   :  { %v260_v19 = vmul.f32 %v1738_v18, %v2211_v39  ;;  %v484_v24 = vpop.permute.xlu0 %483 }
 0x3dc   :  { %v489_v26 = vsel %vm267_vm3, %v484_v24, 0 }
 0x3dd   :  { %v261_v20 = vpack.c.bf16 %v260_v19, %v260_v19 }
 0x3df   :  { %1556 = vmatmul.mubr.msk.bf16.vlgmr.msra.gmra.mrb[4].mxu0 %vm203_vm2, %v261_v20  ;;  %v479_v22 = vpop.xlane.xlu1 %478 }
 0x3e0   :  { %1566 = vmatpush3.bf16.msra.mxu0 %v379_v21  ;;  %1741 = vrcp.f32 %v479_v22  ;;  %1567 = vmatprep.mubr.msk.bf16.mxu0 %vm1934_vm0, %v1933_v0  ;;  %v1713_v21 = vld [vmem:[#allocation7] sm:$0xff]  }
 0x3e1   :  { %1577 = vmatprep.subr.bf16.mxu0 %v1933_v0  ;;  %1644 = vmatpush3.bf16.msra.mxu1 %v1713_v21 }
 0x3e2   :  { %v1740_v14 = vpop.eup %1739  ;;  %1645 = vmatprep.subr.bf16.mxu1 %v1933_v0 }
 0x3e3   :  { %v371_v23 = vmul.f32 %v1740_v14, %v2215_v45  ;;  %v594_v29 = vpop.permute.xlu1 %593 }
 0x3e4   :  { %v599_v31 = vsel %vm267_vm3, %v594_v29, 0 }
 0x3e5   :  { %v372_v25 = vpack.c.bf16 %v371_v23, %v371_v23 }
 0x3e7   :  { %1568 = vmatmul.mubr.msk.bf16.vlgmr.msra.gmra.mrb[8].mxu0 %vm203_vm2, %v372_v25  ;;  %v1714_v25 = vld [vmem:[#allocation7 + $0x8] sm:$0xff]  }
 0x3e8   :  { %1578 = vmatpush3.bf16.msra.mxu0 %v489_v26  ;;  %1579 = vmatprep.mubr.msk.bf16.mxu0 %vm1934_vm0, %v1933_v0 }
 0x3e9   :  { %1589 = vmatprep.subr.bf16.mxu0 %v1933_v0  ;;  %1646 = vmatpush3.bf16.msra.mxu1 %v1714_v25 }
 0x3ea   :  { %v1742_v27 = vpop.eup %1741  ;;  %1659 = vmatprep.subr.bf16.mxu1 %v1933_v0 }
 0x3eb   :  { %v481_v28 = vmul.f32 %v1742_v27, %v2219_v46 }
 0x3ed   :  { %v482_v30 = vpack.c.bf16 %v481_v28, %v481_v28 }
 0x3ef   :  { %1580 = vmatmul.mubr.msk.bf16.vlgmr.msra.gmra.mrb[12].mxu0 %vm203_vm2, %v482_v30 }
 0x3f0   :  { %1590 = vmatpush3.bf16.msra.mxu0 %v599_v31  ;;  %1591 = vmatprep.mubr.msk.bf16.mxu0 %vm1934_vm0, %v1933_v0 }
 0x3f1   :  { %1601 = vmatprep.subr.bf16.mxu0 %v1933_v0 }
 0x40c   :  { %v589_v32 = vpop.xlane.xlu0 %588 }
 0x40d   :  { %1743 = vrcp.f32 %v589_v32 }
 0x410   :  { %v720_v36 = vpop.xlane.xlu0 %719 }
 0x411   :  { %1745 = vrcp.f32 %v720_v36 }
 0x414   :  { %v830_v37 = vpop.xlane.xlu1 %829  ;;  %v940_v38 = vpop.xlane.xlu0 %939 }
 0x415   :  { %1747 = vrcp.f32 %v830_v37 }
 0x416   :  { %1749 = vrcp.f32 %v940_v38 }
 0x417   :  { %v1744_v33 = vpop.eup %1743 }
 0x418   :  { %v591_v34 = vmul.f32 %v1744_v33, %v1728_v62  ;;  %v835_v45 = vpop.permute.xlu1 %834 }
 0x419   :  { %v840_v47 = vsel %vm267_vm3, %v835_v45, 0 }
 0x41a   :  { %v592_v35 = vpack.c.bf16 %v591_v34, %v591_v34 }
 0x41b   :  { %v1746_v39 = vpop.eup %1745 }
 0x41c   :  { %1592 = vmatmul.mubr.msk.bf16.vlgmr.msra.gmra.mrb[16].mxu0 %vm203_vm2, %v592_v35  ;;  %v722_v41 = vmul.f32 %v1746_v39, %v2233_v1  ;;  %v945_v49 = vpop.permute.xlu1 %944 }
 0x41d   :  { %1603 = vmatprep.mubr.msk.bf16.mxu0 %vm1934_vm0, %v1933_v0  ;;  %v950_v52 = vsel %vm267_vm3, %v945_v49, 0 }
 0x41e   :  { %v723_v43 = vpack.c.bf16 %v722_v41, %v722_v41 }
 0x41f   :  { %v1748_v46 = vpop.eup %1747 }
 0x420   :  { %v832_v48 = vmul.f32 %v1748_v46, %v2235_v61  ;;  %v1750_v51 = vpop.eup %1749  ;;  %v1055_v54 = vpop.permute.xlu1 %1054 }
 0x421   :  { %v942_v53 = vmul.f32 %v1750_v51, %v2239_v5  ;;  %v1060_v57 = vsel %vm267_vm3, %v1055_v54, 0 }
 0x422   :  { %v833_v50 = vpack.c.bf16 %v832_v48, %v832_v48 }
 0x423   :  { %v943_v55 = vpack.c.bf16 %v942_v53, %v942_v53 }
 0x42c   :  { %v1050_v40 = vpop.xlane.xlu0 %1049 }
 0x42d   :  { %1751 = vrcp.f32 %v1050_v40 }
 0x430   :  { %v725_v42 = vpop.permute.xlu0 %724 }
 0x431   :  { %v730_v44 = vsel %vm267_vm3, %v725_v42, 0 }
 0x432   :  { %1602 = vmatpush3.bf16.msra.mxu0 %v730_v44 }
 0x433   :  { %1613 = vmatprep.subr.bf16.mxu0 %v1933_v0 }
 0x435   :  { %1604 = vmatmul.mubr.msk.bf16.vlgmr.msra.gmra.mrb[20].mxu0 %vm203_vm2, %v723_v43 }
 0x436   :  { %1614 = vmatpush3.bf16.msra.mxu0 %v840_v47  ;;  %1615 = vmatprep.mubr.msk.bf16.mxu0 %vm1934_vm0, %v1933_v0 }
 0x437   :  { %1625 = vmatprep.subr.bf16.mxu0 %v1933_v0  ;;  %v1752_v56 = vpop.eup %1751 }
 0x438   :  { %v1052_v58 = vmul.f32 %v1752_v56, %v2250_v13 }
 0x43a   :  { %v1053_v59 = vpack.c.bf16 %v1052_v58, %v1052_v58 }
 0x43d   :  { %1616 = vmatmul.mubr.msk.bf16.vlgmr.msra.gmra.mrb[24].mxu0 %vm203_vm2, %v833_v50 }
 0x43e   :  { %1626 = vmatpush3.bf16.msra.mxu0 %v950_v52  ;;  %1627 = vmatprep.mubr.msk.bf16.mxu0 %vm1934_vm0, %v1933_v0  ;;  %v1475_v52 = vld [vmem:[#allocation8] ss:$0 sm:$0xff] }
 0x43f   :  { %1637 = vmatprep.subr.bf16.mxu0 %v1933_v0 }
 0x445   :  { %1628 = vmatmul.mubr.msk.bf16.vlgmr.msra.gmra.mrb[28].mxu0 %vm203_vm2, %v943_v55 }
 0x446   :  { %1638 = vmatpush3.bf16.msra.mxu0 %v1060_v57  ;;  %1639 = vmatprep.mubr.msk.bf16.mxu0 %vm1934_vm0, %v1933_v0 }
 0x447   :  { %1651 = vmatprep.subr.bf16.mxu0 %v1933_v0 }
 0x44d   :  { %1640 = vmatmul.mubr.msk.bf16.vlgmr.msra.gmra.mrb[32].mxu0 %vm203_vm2, %v1053_v59 }
 0x44e   :  { %1655 = vmatprep.mubr.msk.bf16.mxu0 %vm1934_vm0, %v1933_v0 }
 0x4b2   :  { %v305_v11 = vpop.f32.mrb[4].mxu0 }
 0x4b3   :  { %v1557_v60 = vpop.f32.mrb[5].mxu0 }
 0x4b4   :  { %v308_v62 = vpop.f32.mrb[6].mxu0 }
 0x4b5   :  { %v1558_v63 = vpop.f32.mrb[7].mxu0 }
 0x4ba   :  { %v415_v1 = vpop.f32.mrb[8].mxu0 }
 0x4bb   :  { %v1569_v61 = vpop.f32.mrb[9].mxu0 }
 0x4bc   :  { %v418_v2 = vpop.f32.mrb[10].mxu0 }
 0x4bd   :  { %v1570_v5 = vpop.f32.mrb[11].mxu0 }
 0x4c2   :  { %v525_v6 = vpop.f32.mrb[12].mxu0 }
 0x4c3   :  { %v1581_v7 = vpop.f32.mrb[13].mxu0 }
 0x4c4   :  { %v528_v8 = vpop.f32.mrb[14].mxu0 }
 0x4c5   :  { %v1582_v9 = vpop.f32.mrb[15].mxu0 }
 0x4ef   :  { %v635_v10 = vpop.f32.mrb[16].mxu0 }
 0x4f0   :  { %v1593_v12 = vpop.f32.mrb[17].mxu0 }
 0x4f1   :  { %v638_v13 = vpop.f32.mrb[18].mxu0  ;;  %v1717_v12 = vld [vmem:[%s2381_s10] sm:$0xff]  }
 0x4f2   :  { %v1594_v15 = vpop.f32.mrb[19].mxu0  ;;  %v1718_v13 = vld [vmem:[%s2381_s10 + $0x8] sm:$0xff]  }
 0x508   :  { %v766_v16 = vpop.f32.mrb[20].mxu0 }
 0x509   :  { %v1605_v17 = vpop.f32.mrb[21].mxu0 }
 0x50a   :  { %v769_v18 = vpop.f32.mrb[22].mxu0 }
 0x50b   :  { %v1606_v19 = vpop.f32.mrb[23].mxu0 }
 0x510   :  { %v876_v20 = vpop.f32.mrb[24].mxu0 }
 0x511   :  { %v1696_v22 = vpack.i.bf16 %v876_v20, %v415_v1  ;;  %v1617_v14 = vpop.f32.mrb[25].mxu0 }
 0x512   :  { %v879_v23 = vpop.f32.mrb[26].mxu0 }
 0x513   :  { %1697 = vrot.lane.b32.xlu1 %v1696_v22, %s1945_s5  ;;  %v1618_v24 = vpop.f32.mrb[27].mxu0  ;;  %v1479_v22 = vld [vmem:[%s2377_s6] ss:$0 sm:$0xff] }
 0x518   :  { %v986_v26 = vpop.f32.mrb[28].mxu0 }
 0x519   :  { %v1701_v27 = vpack.i.bf16 %v986_v26, %v525_v6  ;;  %v1629_v28 = vpop.f32.mrb[29].mxu0  ;;  %v1480_v26 = vld [vmem:[%s2378_s7] ss:$0 sm:$0xff] }
 0x51a   :  { %v989_v29 = vpop.f32.mrb[30].mxu0 }
 0x51b   :  { %1702 = vrot.lane.b32.xlu1 %v1701_v27, %s1946_s17  ;;  %v1630_v30 = vpop.f32.mrb[31].mxu0 }
 0x520   :  { %v1096_v31 = vpop.f32.mrb[32].mxu0 }
 0x521   :  { %v1706_v32 = vpack.i.bf16 %v1096_v31, %v635_v10  ;;  %v1641_v33 = vpop.f32.mrb[33].mxu0  ;;  %v1716_v10 = vld [vmem:[%s2379_s8 + $0x8] sm:$0xff]   ;;  %v1719_v31 = vld [vmem:[%s2381_s10 + $0x10] sm:$0xff]  }
 0x522   :  { %v1099_v34 = vpop.f32.mrb[34].mxu0  ;;  %v1481_v33 = vld [vmem:[#allocation10] ss:$0 sm:$0xff] }
 0x523   :  { %1707 = vrot.lane.b32.xlu0 %v1706_v32, %s1947_s18  ;;  %v1642_v35 = vpop.f32.mrb[35].mxu0  ;;  %v1720_v32 = vld [vmem:[%s2381_s10 + $0x18] sm:$0xff]  }
 0x585   :  { %v1698_v36 = vpop.permute.xlu1 %1697 }
 0x586   :  { %v1700_v38 = vunpack.i.h.bf16 %v1698_v36  ;;  %v1699_v39 = vunpack.i.l.bf16 %v1698_v36 }
 0x588   :  { %v1114_v44 = vsel %vm203_vm2, %v766_v16, %v1700_v38  ;;  %v653_v45 = vsel %vm203_vm2, %v305_v11, %v1699_v39 }
 0x58d   :  { %v1703_v37 = vpop.permute.xlu1 %1702 }
 0x58e   :  { %v1705_v40 = vunpack.i.h.bf16 %v1703_v37  ;;  %v1704_v41 = vunpack.i.l.bf16 %v1703_v37 }
 0x590   :  { %v1115_v47 = vsel %vm654_vm4, %v1114_v44, %v1705_v40  ;;  %v655_v48 = vsel %vm654_vm4, %v653_v45, %v1704_v41  ;;  %v1485_v44 = vld [vmem:[#allocation11] ss:$0 sm:$0xff] }
 0x595   :  { %v1708_v42 = vpop.permute.xlu0 %1707 }
 0x596   :  { %v1710_v43 = vunpack.i.h.bf16 %v1708_v42  ;;  %v1709_v46 = vunpack.i.l.bf16 %v1708_v42 }
 0x598   :  { %v1116_v49 = vsel %vm656_vm5, %v1115_v47, %v1710_v43  ;;  %v657_v50 = vsel %vm656_vm5, %v655_v48, %v1709_v46 }
 0x599   :  { %v1117_v51 = vpack.c.bf16 %v1116_v49, %v657_v50 }
 0x59b   :  { %1648 = vmatmul.mubr.msk.bf16.vlgmr.msra.gmra.mrb[32].mxu1 %vm150_vm1, %v1117_v51 }
 0x59c   :  { %1667 = vmatprep.mubr.msk.bf16.mxu1 %vm1934_vm0, %v1933_v0  ;;  %1660 = vmatpush3.bf16.msra.mxu1 %v1717_v12 }
 0x59d   :  { %1661 = vmatprep.subr.bf16.mxu1 %v1933_v0 }
 0x5a0   :  { %1662 = vmatpush3.bf16.msra.mxu1 %v1718_v13 }
 0x5a1   :  { %1663 = vmatprep.subr.bf16.mxu1 %v1933_v0 }
 0x5a4   :  { %1664 = vmatpush3.bf16.msra.mxu1 %v1719_v31 }
 0x5a5   :  { %1665 = vmatprep.subr.bf16.mxu1 %v1933_v0 }
 0x5a8   :  { %1666 = vmatpush3.bf16.msra.mxu1 %v1720_v32 }
 0x66e   :  { %v1178_v53 = vpop.f32.mrb[32].mxu1 }
 0x66f   :  { %v1179_v54 = vadd.f32 %v1475_v52, %v1178_v53  ;;  %v1649_v55 = vpop.f32.mrb[33].mxu1 }
 0x670   :  { %v1181_v56 = vpop.f32.mrb[34].mxu1 }
 0x671   :  { %v1182_v57 = vadd.f32 %v1475_v52, %v1181_v56  ;;  %v1650_v58 = vpop.f32.mrb[35].mxu1  ;;  %v1185_v59 = vadd.f32 %v1179_v54, %v2110_v3 }
 0x673   :  { %v1189_v11 = vsel %vm150_vm1, %v1185_v59, 0.0  ;;  %v1186_v60 = vadd.f32 %v1182_v57, %v2115_v4  ;;  %v1715_v4 = vld [vmem:[%s2379_s8] sm:$0xff]  }
 0x674   :  { %1190 = vadd.xlane.f32.xlu1 %v1189_v11  ;;  %1652 = vmatpush3.bf16.msra.mxu0 %v1715_v4  ;;  %v1492_v4 = vld [vmem:[%s2384_s13] ss:$0 sm:$0xff] }
 0x675   :  { %v1192_v62 = vsel %vm150_vm1, %v1186_v60, 0.0  ;;  %1653 = vmatprep.subr.bf16.mxu0 %v1933_v0 }
 0x676   :  { %1193 = vadd.xlane.f32.xlu0 %v1192_v62 }
 0x678   :  { %1654 = vmatpush3.bf16.msra.mxu0 %v1716_v10 }
 0x701   :  { %v1191_v63 = vpop.xlane.xlu1 %1190 }
 0x702   :  { %v1196_v1 = vmul.f32 0.03125, %v1191_v63 }
 0x703   :  { %v1194_v61 = vpop.xlane.xlu0 %1193 }
 0x704   :  { %v1198_v2 = vsub.f32 %v1185_v59, %v1196_v1  ;;  %v1197_v5 = vmul.f32 0.03125, %v1194_v61 }
 0x706   :  { %v1199_v6 = vsub.f32 %v1186_v60, %v1197_v5  ;;  %v1200_v7 = vmul.f32 %v1198_v2, %v1198_v2 }
 0x708   :  { %v1202_v8 = vsel %vm150_vm1, %v1200_v7, 0.0  ;;  %v1201_v9 = vmul.f32 %v1199_v6, %v1199_v6 }
 0x709   :  { %1203 = vadd.xlane.f32.xlu0 %v1202_v8  ;;  %v1491_v8 = vld [vmem:[%s2383_s12] ss:$0 sm:$0xff] }
 0x70a   :  { %v1205_v3 = vsel %vm150_vm1, %v1201_v9, 0.0 }
 0x70b   :  { %1206 = vadd.xlane.f32.xlu1 %v1205_v3 }
 0x796   :  { %v1204_v15 = vpop.xlane.xlu0 %1203 }
 0x797   :  { %v1208_v16 = vmul.f32 0.03125, %v1204_v15 }
 0x798   :  { %v1207_v17 = vpop.xlane.xlu1 %1206 }
 0x799   :  { %v1210_v18 = vadd.f32 1e-05, %v1208_v16  ;;  %v1209_v19 = vmul.f32 0.03125, %v1207_v17 }
 0x79b   :  { %1753 = vrsqrt.f32 %v1210_v18  ;;  %v1211_v20 = vadd.f32 1e-05, %v1209_v19 }
 0x79d   :  { %1755 = vrsqrt.f32 %v1211_v20 }
 0x7a5   :  { %v1754_v21 = vpop.eup %1753 }
 0x7a6   :  { %v1214_v14 = vmul.f32 %v1754_v21, %v1198_v2 }
 0x7a7   :  { %v1756_v23 = vpop.eup %1755 }
 0x7a8   :  { %v1222_v24 = vmul.f32 %v1479_v22, %v1214_v14  ;;  %v1215_v25 = vmul.f32 %v1756_v23, %v1199_v6 }
 0x7aa   :  { %v1223_v27 = vmul.f32 %v1479_v22, %v1215_v25  ;;  %v1230_v28 = vadd.f32 %v1480_v26, %v1222_v24 }
 0x7ac   :  { %v1231_v29 = vadd.f32 %v1480_v26, %v1223_v27 }
 0x7ae   :  { %v1232_v30 = vpack.c.bf16 %v1231_v29, %v1230_v28 }
 0x7b0   :  { %1656 = vmatmul.mubr.msk.bf16.vlgmr.msra.gmra.mrb[36].mxu0 %vm150_vm1, %v1232_v30 }
 0x883   :  { %v1293_v34 = vpop.f32.mrb[36].mxu0 }
 0x884   :  { %v1294_v35 = vadd.f32 %v1481_v33, %v1293_v34  ;;  %v1657_v36 = vpop.f32.mrb[37].mxu0 }
 0x885   :  { %v1296_v37 = vpop.f32.mrb[38].mxu0 }
 0x886   :  { %v1297_v38 = vadd.f32 %v1481_v33, %v1296_v37  ;;  %v1658_v39 = vpop.f32.mrb[39].mxu0  ;;  %v1300_v40 = vmax.f32 %v1294_v35, 0.0 }
 0x888   :  { %v1301_v41 = vmax.f32 %v1297_v38, 0.0 }
 0x88a   :  { %v1302_v42 = vpack.c.bf16 %v1301_v41, %v1300_v40 }
 0x88c   :  { %1668 = vmatmul.mubr.msk.bf16.vlgmr.msra.gmra.mrb[36].mxu1 %vm1342_vm6, %v1302_v42 }
 0x95f   :  { %v1380_v45 = vpop.f32.mrb[36].mxu1 }
 0x960   :  { %v1381_v0 = vadd.f32 %v1485_v44, %v1380_v45  ;;  %v1669_v43 = vpop.f32.mrb[37].mxu1 }
 0x961   :  { %v1383_v46 = vpop.f32.mrb[38].mxu1 }
 0x962   :  { %v1384_v47 = vadd.f32 %v1485_v44, %v1383_v46  ;;  %v1670_v48 = vpop.f32.mrb[39].mxu1  ;;  %v1387_v49 = vadd.f32 %v1381_v0, %v1230_v28 }
 0x964   :  { %v1391_v50 = vsel %vm150_vm1, %v1387_v49, 0.0  ;;  %v1388_v51 = vadd.f32 %v1384_v47, %v1231_v29 }
 0x965   :  { %1392 = vadd.xlane.f32.xlu0 %v1391_v50 }
 0x966   :  { %v1394_v52 = vsel %vm150_vm1, %v1388_v51, 0.0 }
 0x967   :  { %1395 = vadd.xlane.f32.xlu1 %v1394_v52 }
 0x9f2   :  { %v1393_v53 = vpop.xlane.xlu0 %1392 }
 0x9f3   :  { %v1397_v54 = vmul.f32 0.03125, %v1393_v53 }
 0x9f4   :  { %v1396_v55 = vpop.xlane.xlu1 %1395 }
 0x9f5   :  { %v1399_v56 = vsub.f32 %v1387_v49, %v1397_v54  ;;  %v1398_v57 = vmul.f32 0.03125, %v1396_v55 }
 0x9f7   :  { %v1400_v58 = vsub.f32 %v1388_v51, %v1398_v57  ;;  %v1401_v59 = vmul.f32 %v1399_v56, %v1399_v56 }
 0x9f9   :  { %v1403_v11 = vsel %vm150_vm1, %v1401_v59, 0.0  ;;  %v1402_v60 = vmul.f32 %v1400_v58, %v1400_v58 }
 0x9fa   :  { %1404 = vadd.xlane.f32.xlu0 %v1403_v11 }
 0x9fb   :  { %v1406_v62 = vsel %vm150_vm1, %v1402_v60, 0.0 }
 0x9fc   :  { %1407 = vadd.xlane.f32.xlu1 %v1406_v62 }
 0xa87   :  { %v1405_v63 = vpop.xlane.xlu0 %1404 }
 0xa88   :  { %v1409_v1 = vmul.f32 0.03125, %v1405_v63 }
 0xa89   :  { %v1408_v61 = vpop.xlane.xlu1 %1407 }
 0xa8a   :  { %v1411_v2 = vadd.f32 1e-05, %v1409_v1  ;;  %v1410_v5 = vmul.f32 0.03125, %v1408_v61 }
 0xa8c   :  { %1757 = vrsqrt.f32 %v1411_v2  ;;  %v1412_v6 = vadd.f32 1e-05, %v1410_v5 }
 0xa8e   :  { %1759 = vrsqrt.f32 %v1412_v6 }
 0xa96   :  { %v1758_v7 = vpop.eup %1757 }
 0xa97   :  { %v1415_v9 = vmul.f32 %v1758_v7, %v1399_v56 }
 0xa98   :  { %v1760_v3 = vpop.eup %1759 }
 0xa99   :  { %v1423_v10 = vmul.f32 %v1491_v8, %v1415_v9  ;;  %v1416_v12 = vmul.f32 %v1760_v3, %v1400_v58 }
 0xa9b   :  { %v1424_v13 = vmul.f32 %v1491_v8, %v1416_v12  ;;  %v1431_v15 = vadd.f32 %v1492_v4, %v1423_v10 }
 0xa9d   :  { %v1432_v16 = vadd.f32 %v1492_v4, %v1424_v13  ;;  %1433 = vst.msk [vmem:[#allocation13] sm:$0xff] %vm150_vm1, %v1431_v15 }
 0xa9f   :  { %1434 = vst.msk [vmem:[#allocation13 + $0x8] sm:$0xff] %vm150_vm1, %v1432_v16 }
 0xaa0   :  { %1904 = shalt.err (!%p1901_p10)
}
 0xaa1   :  { %s1905_s2 = scalar_lea.hbm %s2385_s14, 256 }
 0xaa2   :  { %p1906_p11 = scmp.ne.s32.totalorder %s2385_s14, %s1905_s2  ;;  %p1909_p12 = scmp.lt.u32.totalorder %s1905_s2, %s2385_s14 }
 0xaa4   :  { %p1911_p13 = pnand %p1909_p12, %p1906_p11 }
 0xaa6   :  { %1914 = shalt.err (!%p1911_p13)
}
 0xaa7   :  { %s1949_s20 = smov 128  }
 0xaa8   :  { %1446 = dma.vmem_to_hbm [thread:$0]  %s1441_s15, 256, %s2385_s14, [#allocation4], %s1949_s20, %s1949_s20, %s1945_s5  }
 0xaa9   :  { %1923 = dma.done.wait [#allocation4], 256  }
 0xaaa   :  { %1924 = vsyncadd [#allocation4], 4294967040 }
 0xaab   :  { %1450 = vsyncpa [#allocation3], 1 }
 0xaac   :  { %1451 = vsyncpa [#allocation6], 1 }
 0xaad   :  { %1452 = vsyncpa [#allocation9], 1 }
 0xaae   :  { %1453 = vsyncpa [#allocation12], 1 }
 0xaaf   :  { %1454 = vsyncpa [#allocation4], 1 }

</bundles_post_ra>
